<compile_context>
chip_gen: v6e
topology: v6e:2x2x1
jax: 0.10.0
libtpu: 0.0.40
codegen_flags: <defaults>
</compile_context>

<pallas_src>
import functools
import numpy as np
import jax
import jax.numpy as jnp
from jax.experimental import pallas as pl
from jax.experimental.pallas import tpu as pltpu

HIDDEN = 64


def _mi_kernel(x_ref, slab_ref, w2_ref, w3_ref, out_ref, acc_ref, rhs_ref,
               *, n_nodes, n_in, node_dim, hidden, tc_size):
    f32 = jnp.float32
    bf16 = jnp.bfloat16
    t_idx = pl.program_id(1)

    # Packed param slab (fetched once; constant index map): [:,0:F]=W1, then b1,b2,b3.
    slab = slab_ref[...]
    w1 = slab[0:hidden, 0:n_in].astype(bf16)                       # [64, F]  MXU lhs
    # Hoist bias broadcasts out of the per-time-step loop (no CSE of broadcast_in_dim).
    b1 = jnp.broadcast_to(slab[0:hidden, n_in:n_in + 1], (hidden, n_nodes))
    b2 = jnp.broadcast_to(slab[0:hidden, n_in + 1:n_in + 2], (hidden, n_nodes))
    b3 = slab[0:node_dim, n_in + 2:n_in + 3]                       # [D, 1]
    w2 = w2_ref[...]                                               # [64, 64] bf16

    @pl.when(t_idx == 0)
    def _init():
        # Fold the conv-3 bias into the accumulator init; zero the padded gram rhs once.
        acc_ref[...] = jnp.broadcast_to(b3, (node_dim, n_nodes))
        rhs_ref[...] = jnp.zeros_like(rhs_ref)

    # Per time step inside this chunk: 3 small bf16 MXU matmuls, f32 bias+ReLU on VPU.
    for t in range(tc_size):
        xt = x_ref[0, t].astype(bf16)                              # [F, N]  lane-dense
        h1 = jnp.dot(w1, xt, preferred_element_type=f32) + b1      # [64, N]
        h1 = jnp.maximum(h1, 0.0).astype(bf16)
        h2 = jnp.dot(w2, h1, preferred_element_type=f32) + b2      # [64, N]
        h2 = jnp.maximum(h2, 0.0).astype(bf16)
        # (1, n_hist) conv == accumulate W3_t [D,64] @ h2 [64,N] over time.
        acc_ref[...] += jnp.dot(w3_ref[t], h2, preferred_element_type=f32)

    # TODO(synk): training-mode dropout not implemented; eval-mode dropout is identity.

    @pl.when(t_idx == pl.num_programs(1) - 1)
    def _finalize():
        nodes_t = acc_ref[...]                                     # [D, N] f32 (channel-major)
        # Zero-padded rhs slab (scratch, no concatenate); explicit bf16 => one MXU pass.
        rhs_ref[:, 0:n_nodes] = nodes_t.astype(bf16)               # [D, n_pad]
        lhs = jnp.transpose(nodes_t).astype(bf16)                  # [N, D]  (tiny transpose)
        # A[u, v] = sum_d nodes[u,d] * nodes[v,d]; lane-dense [N, n_pad] output slab.
        out_ref[0] = jnp.dot(lhs, rhs_ref[...], preferred_element_type=f32)


def mi_learner_forward(inputs, params, *, node_dim, hidden=HIDDEN, time_chunk=None):
    """inputs: [B, T, N, F]; params = (slab, w2_bf16, w3_bf16) from init_params."""
    B, T, N, F = inputs.shape
    slab, w2, w3 = params
    tc_size = T if time_chunk is None else time_chunk
    assert T % tc_size == 0, "time_chunk must divide n_hist"
    n_tc = T // tc_size
    n_pad = max(pl.cdiv(N, 128) * 128, 128)            # lane-dense output width
    slab_rows = slab.shape[0]

    # One cheap XLA transpose -> channel-major per-time-step tiles [F, N] (nodes on lanes).
    x = jnp.transpose(inputs, (0, 1, 3, 2)).astype(jnp.float32)    # [B, T, F, N]

    kernel = functools.partial(_mi_kernel, n_nodes=N, n_in=F, node_dim=node_dim,
                               hidden=hidden, tc_size=tc_size)
    out_padded = pl.pallas_call(
        kernel,
        out_shape=jax.ShapeDtypeStruct((B, N, n_pad), jnp.float32),
        grid_spec=pltpu.PrefetchScalarGridSpec(
            num_scalar_prefetch=0,
            grid=(B, n_tc),                 # batch parallel, time-chunk reduction
            in_specs=[
                pl.BlockSpec((1, tc_size, F, N), lambda b, t: (b, t, 0, 0)),
                pl.BlockSpec((slab_rows, F + 3), lambda b, t: (0, 0)),
                pl.BlockSpec((hidden, hidden), lambda b, t: (0, 0)),
                pl.BlockSpec((tc_size, node_dim, hidden), lambda b, t: (t, 0, 0)),
            ],
            out_specs=pl.BlockSpec((1, N, n_pad), lambda b, t: (b, 0, 0)),
            scratch_shapes=[
                pltpu.VMEM((node_dim, N), jnp.float32),        # nodes accumulator [D, N]
                pltpu.VMEM((node_dim, n_pad), jnp.bfloat16),   # zero-padded gram rhs
            ],
        ),
        # Explicit scoped-VMEM limit; raise toward ~100 MiB on v5e/v6e, keep <= ~56 MiB
        # on v7x when scaling tile sizes.  Demo usage is far below this.
        compiler_params=pltpu.CompilerParams(
            dimension_semantics=("parallel", "arbitrary"),
            vmem_limit_bytes=32 * 1024 * 1024,
        ),
    )(x, slab, w2, w3)

    if n_pad == N:          # at real sizes choose N % 128 == 0 so this slice is identity
        return out_padded
    return out_padded[:, :, :N]


def init_params(key, n_hist, n_in, node_dim, hidden=HIDDEN):
    """Deterministic PyTorch-Conv2d-style init. Returns (kernel-layout params, raw conv params)."""
    ks = jax.random.split(key, 6)

    def u(k, shape, fan_in):
        bound = 1.0 / np.sqrt(fan_in)
        return jax.random.uniform(k, shape, jnp.float32, -bound, bound)

    w1c = u(ks[0], (hidden, n_in, 1, 1), n_in)                      # Conv2d(n_in, 64, (1,1))
    b1c = u(ks[1], (hidden,), n_in)
    w2c = u(ks[2], (hidden, hidden, 1, 1), hidden)                  # Conv2d(64, 64, (1,1))
    b2c = u(ks[3], (hidden,), hidden)
    w3c = u(ks[4], (node_dim, hidden, 1, n_hist), hidden * n_hist)  # Conv2d(64, node_dim, (1,T))
    b3c = u(ks[5], (node_dim,), hidden * n_hist)

    # Packed f32 slab: cols [0:F]=W1 (out,in), [F]=b1, [F+1]=b2, [F+2]=b3 (rows 0:D).
    rows = max(hidden, node_dim)
    slab = jnp.zeros((rows, n_in + 3), jnp.float32)
    slab = slab.at[0:hidden, 0:n_in].set(w1c[:, :, 0, 0])
    slab = slab.at[0:hidden, n_in].set(b1c)
    slab = slab.at[0:hidden, n_in + 1].set(b2c)
    slab = slab.at[0:node_dim, n_in + 2].set(b3c)

    # MXU-path weights in bf16 (f32 accumulation in-kernel).
    w2k = w2c[:, :, 0, 0].astype(jnp.bfloat16)                               # [64, 64] (out,in)
    w3k = jnp.transpose(w3c[:, :, 0, :], (2, 0, 1)).astype(jnp.bfloat16)     # [T, D, 64]

    mat_params = (slab, w2k, w3k)
    raw_params = (w1c, b1c, w2c, b2c, w3c, b3c)
    return mat_params, raw_params


def reference_forward(inputs, raw_params):
    """Pure numpy (float64) replication of the PyTorch forward (NCHW convs)."""
    w1c, b1c, w2c, b2c, w3c, b3c = [np.asarray(p, dtype=np.float64) for p in raw_params]
    x = np.asarray(inputs, dtype=np.float64).transpose(0, 3, 2, 1)             # [B, F, N, T]
    h1 = np.maximum(np.einsum('of,bfnt->bont', w1c[:, :, 0, 0], x)
                    + b1c[None, :, None, None], 0.0)
    h2 = np.maximum(np.einsum('oc,bcnt->bont', w2c[:, :, 0, 0], h1)
                    + b2c[None, :, None, None], 0.0)
    nodes_c = np.einsum('dct,bcnt->bdn', w3c[:, :, 0, :], h2) + b3c[None, :, None]
    nodes = nodes_c.transpose(0, 2, 1)                                         # [B, N, D]
    return np.einsum('bud,bvd->buv', nodes, nodes)                             # [B, N, N]


if __name__ == "__main__":
    B, T, N, F = 2, 8, 16, 4        # batch, n_hist, nodes, n_in
    NODE_DIM = 32

    key = jax.random.PRNGKey(0)
    k_x, k_p = jax.random.split(key)
    inputs = jax.random.normal(k_x, (B, T, N, F), dtype=jnp.float32)
    mat_params, raw_params = init_params(k_p, n_hist=T, n_in=F, node_dim=NODE_DIM)

    # time_chunk=4 exercises the (parallel batch) x (arbitrary time-chunk) grid: (2, 2).
    out = mi_learner_forward(inputs, mat_params, node_dim=NODE_DIM, time_chunk=4)
    out = jax.block_until_ready(out)

    ref = reference_forward(inputs, raw_params)
    # End-to-end bf16-in/f32-acc MXU pipeline: loose tolerance is intentional.
    np.testing.assert_allclose(np.asarray(out), ref, rtol=3e-2, atol=2e-2)
    assert out.shape == (B, N, N)

    print("KERNEL_OK")
</pallas_src>

<mosaic_0001>
module attributes {stable_mosaic.version = 11 : i64} {
  func.func @_mi_kernel(%arg0: i32, %arg1: i32, %arg2: memref<1x4x4x16xf32, #tpu.memory_space<vmem>>, %arg3: memref<64x7xf32, #tpu.memory_space<vmem>>, %arg4: memref<64x64xbf16, #tpu.memory_space<vmem>>, %arg5: memref<4x32x64xbf16, #tpu.memory_space<vmem>>, %arg6: memref<1x16x128xf32, #tpu.memory_space<vmem>>, %arg7: memref<32x16xf32, #tpu.memory_space<vmem>>, %arg8: memref<32x128xbf16, #tpu.memory_space<vmem>>) attributes {dimension_semantics = [#tpu.dimension_semantics<parallel>, #tpu.dimension_semantics<arbitrary>], iteration_bounds = array<i64: 2, 2>, scalar_prefetch = 0 : i64, scratch_operands = 2 : i64, tpu.core_type = #tpu.core_type<tc>, window_params = [{transform_indices = @transform_0, window_bounds = array<i64: 1, 4, 4, 16>}, {pipeline_mode = #tpu.pipeline_mode<synchronous>, transform_indices = @transform_1, window_bounds = array<i64: 64, 7>}, {pipeline_mode = #tpu.pipeline_mode<synchronous>, transform_indices = @transform_2, window_bounds = array<i64: 64, 64>}, {transform_indices = @transform_3, window_bounds = array<i64: 4, 32, 64>}, {transform_indices = @transform_4, window_bounds = array<i64: 1, 16, 128>}]} {
    %c0 = arith.constant 0 : index
    %c0_0 = arith.constant 0 : index
    %0 = vector.load %arg3[%c0, %c0_0] : memref<64x7xf32, #tpu.memory_space<vmem>>, vector<64x7xf32>
    %1 = vector.extract_strided_slice %0 {offsets = [0, 0], sizes = [64, 4], strides = [1, 1]} : vector<64x7xf32> to vector<64x4xf32>
    %2 = arith.truncf %1 : vector<64x4xf32> to vector<64x4xbf16>
    %3 = vector.extract_strided_slice %0 {offsets = [0, 4], sizes = [64, 1], strides = [1, 1]} : vector<64x7xf32> to vector<64x1xf32>
    %4 = vector.shape_cast %3 : vector<64x1xf32> to vector<64x1xf32>
    %5 = vector.broadcast %4 : vector<64x1xf32> to vector<64x16xf32>
    %6 = vector.extract_strided_slice %0 {offsets = [0, 5], sizes = [64, 1], strides = [1, 1]} : vector<64x7xf32> to vector<64x1xf32>
    %7 = vector.shape_cast %6 : vector<64x1xf32> to vector<64x1xf32>
    %8 = vector.broadcast %7 : vector<64x1xf32> to vector<64x16xf32>
    %9 = vector.extract_strided_slice %0 {offsets = [0, 6], sizes = [32, 1], strides = [1, 1]} : vector<64x7xf32> to vector<32x1xf32>
    %c0_1 = arith.constant 0 : index
    %c0_2 = arith.constant 0 : index
    %10 = vector.load %arg4[%c0_1, %c0_2] : memref<64x64xbf16, #tpu.memory_space<vmem>>, vector<64x64xbf16>
    %c0_i32 = arith.constant 0 : i32
    %11 = arith.cmpi eq, %arg1, %c0_i32 : i32
    %12 = arith.extui %11 : i1 to i32
    %c0_i32_3 = arith.constant 0 : i32
    %13 = arith.cmpi ne, %12, %c0_i32_3 : i32
    scf.if %13 {
      %93 = vector.shape_cast %9 : vector<32x1xf32> to vector<32x1xf32>
      %94 = vector.broadcast %93 : vector<32x1xf32> to vector<32x16xf32>
      %c0_65 = arith.constant 0 : index
      %c0_66 = arith.constant 0 : index
      %95 = vector.load %arg7[%c0_65, %c0_66] : memref<32x16xf32, #tpu.memory_space<vmem>>, vector<32x16xf32>
      tpu.vector_store %arg7[%c0_65, %c0_66], %94 {strides = array<i32>} : memref<32x16xf32, #tpu.memory_space<vmem>>, vector<32x16xf32>,
      %cst_67 = arith.constant 0.000000e+00 : bf16
      %96 = vector.broadcast %cst_67 : bf16 to vector<32x128xbf16>
      %c0_68 = arith.constant 0 : index
      %c0_69 = arith.constant 0 : index
      %97 = vector.load %arg8[%c0_68, %c0_69] : memref<32x128xbf16, #tpu.memory_space<vmem>>, vector<32x128xbf16>
      tpu.vector_store %arg8[%c0_68, %c0_69], %96 {strides = array<i32>} : memref<32x128xbf16, #tpu.memory_space<vmem>>, vector<32x128xbf16>,
    } else {
    }
    %c0_4 = arith.constant 0 : index
    %c0_5 = arith.constant 0 : index
    %c0_6 = arith.constant 0 : index
    %c0_7 = arith.constant 0 : index
    %14 = vector.load %arg2[%c0_4, %c0_5, %c0_6, %c0_7] : memref<1x4x4x16xf32, #tpu.memory_space<vmem>>, vector<1x1x4x16xf32>
    %15 = vector.shape_cast %14 : vector<1x1x4x16xf32> to vector<4x16xf32>
    %16 = arith.truncf %15 : vector<4x16xf32> to vector<4x16xbf16>
    %cst = arith.constant dense<0.000000e+00> : vector<64x16xf32>
    %17 = tpu.matmul %2, %16, %cst {dimension_numbers = #tpu.dot_dimension_numbers<[1], [0], [0], [1], [0, 0, 1, 1], [], []>} : vector<64x4xbf16>, vector<4x16xbf16>, vector<64x16xf32> -> vector<64x16xf32>
    %18 = arith.addf %17, %5 : vector<64x16xf32>
    %cst_8 = arith.constant 0.000000e+00 : f32
    %19 = vector.broadcast %cst_8 : f32 to vector<64x16xf32>
    %20 = arith.maximumf %18, %19 : vector<64x16xf32>
    %21 = arith.truncf %20 : vector<64x16xf32> to vector<64x16xbf16>
    %cst_9 = arith.constant dense<0.000000e+00> : vector<64x16xf32>
    %22 = tpu.matmul %10, %21, %cst_9 {dimension_numbers = #tpu.dot_dimension_numbers<[1], [0], [0], [1], [0, 0, 1, 1], [], []>} : vector<64x64xbf16>, vector<64x16xbf16>, vector<64x16xf32> -> vector<64x16xf32>
    %23 = arith.addf %22, %8 : vector<64x16xf32>
    %cst_10 = arith.constant 0.000000e+00 : f32
    %24 = vector.broadcast %cst_10 : f32 to vector<64x16xf32>
    %25 = arith.maximumf %23, %24 : vector<64x16xf32>
    %26 = arith.truncf %25 : vector<64x16xf32> to vector<64x16xbf16>
    %c0_11 = arith.constant 0 : index
    %c0_12 = arith.constant 0 : index
    %27 = vector.load %arg7[%c0_11, %c0_12] : memref<32x16xf32, #tpu.memory_space<vmem>>, vector<32x16xf32>
    %c0_13 = arith.constant 0 : index
    %c0_14 = arith.constant 0 : index
    %c0_15 = arith.constant 0 : index
    %28 = vector.load %arg5[%c0_13, %c0_14, %c0_15] : memref<4x32x64xbf16, #tpu.memory_space<vmem>>, vector<1x32x64xbf16>
    %29 = vector.shape_cast %28 : vector<1x32x64xbf16> to vector<32x64xbf16>
    %cst_16 = arith.constant dense<0.000000e+00> : vector<32x16xf32>
    %30 = tpu.matmul %29, %26, %cst_16 {dimension_numbers = #tpu.dot_dimension_numbers<[1], [0], [0], [1], [0, 0, 1, 1], [], []>} : vector<32x64xbf16>, vector<64x16xbf16>, vector<32x16xf32> -> vector<32x16xf32>
    %31 = arith.addf %27, %30 : vector<32x16xf32>
    %c0_17 = arith.constant 0 : index
    %c0_18 = arith.constant 0 : index
    %32 = vector.load %arg7[%c0_17, %c0_18] : memref<32x16xf32, #tpu.memory_space<vmem>>, vector<32x16xf32>
    tpu.vector_store %arg7[%c0_17, %c0_18], %31 {strides = array<i32>} : memref<32x16xf32, #tpu.memory_space<vmem>>, vector<32x16xf32>,
    %c0_19 = arith.constant 0 : index
    %c1 = arith.constant 1 : index
    %c0_20 = arith.constant 0 : index
    %c0_21 = arith.constant 0 : index
    %33 = vector.load %arg2[%c0_19, %c1, %c0_20, %c0_21] : memref<1x4x4x16xf32, #tpu.memory_space<vmem>>, vector<1x1x4x16xf32>
    %34 = vector.shape_cast %33 : vector<1x1x4x16xf32> to vector<4x16xf32>
    %35 = arith.truncf %34 : vector<4x16xf32> to vector<4x16xbf16>
    %cst_22 = arith.constant dense<0.000000e+00> : vector<64x16xf32>
    %36 = tpu.matmul %2, %35, %cst_22 {dimension_numbers = #tpu.dot_dimension_numbers<[1], [0], [0], [1], [0, 0, 1, 1], [], []>} : vector<64x4xbf16>, vector<4x16xbf16>, vector<64x16xf32> -> vector<64x16xf32>
    %37 = arith.addf %36, %5 : vector<64x16xf32>
    %cst_23 = arith.constant 0.000000e+00 : f32
    %38 = vector.broadcast %cst_23 : f32 to vector<64x16xf32>
    %39 = arith.maximumf %37, %38 : vector<64x16xf32>
    %40 = arith.truncf %39 : vector<64x16xf32> to vector<64x16xbf16>
    %cst_24 = arith.constant dense<0.000000e+00> : vector<64x16xf32>
    %41 = tpu.matmul %10, %40, %cst_24 {dimension_numbers = #tpu.dot_dimension_numbers<[1], [0], [0], [1], [0, 0, 1, 1], [], []>} : vector<64x64xbf16>, vector<64x16xbf16>, vector<64x16xf32> -> vector<64x16xf32>
    %42 = arith.addf %41, %8 : vector<64x16xf32>
    %cst_25 = arith.constant 0.000000e+00 : f32
    %43 = vector.broadcast %cst_25 : f32 to vector<64x16xf32>
    %44 = arith.maximumf %42, %43 : vector<64x16xf32>
    %45 = arith.truncf %44 : vector<64x16xf32> to vector<64x16xbf16>
    %c0_26 = arith.constant 0 : index
    %c0_27 = arith.constant 0 : index
    %46 = vector.load %arg7[%c0_26, %c0_27] : memref<32x16xf32, #tpu.memory_space<vmem>>, vector<32x16xf32>
    %c1_28 = arith.constant 1 : index
    %c0_29 = arith.constant 0 : index
    %c0_30 = arith.constant 0 : index
    %47 = vector.load %arg5[%c1_28, %c0_29, %c0_30] : memref<4x32x64xbf16, #tpu.memory_space<vmem>>, vector<1x32x64xbf16>
    %48 = vector.shape_cast %47 : vector<1x32x64xbf16> to vector<32x64xbf16>
    %cst_31 = arith.constant dense<0.000000e+00> : vector<32x16xf32>
    %49 = tpu.matmul %48, %45, %cst_31 {dimension_numbers = #tpu.dot_dimension_numbers<[1], [0], [0], [1], [0, 0, 1, 1], [], []>} : vector<32x64xbf16>, vector<64x16xbf16>, vector<32x16xf32> -> vector<32x16xf32>
    %50 = arith.addf %46, %49 : vector<32x16xf32>
    %c0_32 = arith.constant 0 : index
    %c0_33 = arith.constant 0 : index
    %51 = vector.load %arg7[%c0_32, %c0_33] : memref<32x16xf32, #tpu.memory_space<vmem>>, vector<32x16xf32>
    tpu.vector_store %arg7[%c0_32, %c0_33], %50 {strides = array<i32>} : memref<32x16xf32, #tpu.memory_space<vmem>>, vector<32x16xf32>,
    %c0_34 = arith.constant 0 : index
    %c2 = arith.constant 2 : index
    %c0_35 = arith.constant 0 : index
    %c0_36 = arith.constant 0 : index
    %52 = vector.load %arg2[%c0_34, %c2, %c0_35, %c0_36] : memref<1x4x4x16xf32, #tpu.memory_space<vmem>>, vector<1x1x4x16xf32>
    %53 = vector.shape_cast %52 : vector<1x1x4x16xf32> to vector<4x16xf32>
    %54 = arith.truncf %53 : vector<4x16xf32> to vector<4x16xbf16>
    %cst_37 = arith.constant dense<0.000000e+00> : vector<64x16xf32>
    %55 = tpu.matmul %2, %54, %cst_37 {dimension_numbers = #tpu.dot_dimension_numbers<[1], [0], [0], [1], [0, 0, 1, 1], [], []>} : vector<64x4xbf16>, vector<4x16xbf16>, vector<64x16xf32> -> vector<64x16xf32>
    %56 = arith.addf %55, %5 : vector<64x16xf32>
    %cst_38 = arith.constant 0.000000e+00 : f32
    %57 = vector.broadcast %cst_38 : f32 to vector<64x16xf32>
    %58 = arith.maximumf %56, %57 : vector<64x16xf32>
    %59 = arith.truncf %58 : vector<64x16xf32> to vector<64x16xbf16>
    %cst_39 = arith.constant dense<0.000000e+00> : vector<64x16xf32>
    %60 = tpu.matmul %10, %59, %cst_39 {dimension_numbers = #tpu.dot_dimension_numbers<[1], [0], [0], [1], [0, 0, 1, 1], [], []>} : vector<64x64xbf16>, vector<64x16xbf16>, vector<64x16xf32> -> vector<64x16xf32>
    %61 = arith.addf %60, %8 : vector<64x16xf32>
    %cst_40 = arith.constant 0.000000e+00 : f32
    %62 = vector.broadcast %cst_40 : f32 to vector<64x16xf32>
    %63 = arith.maximumf %61, %62 : vector<64x16xf32>
    %64 = arith.truncf %63 : vector<64x16xf32> to vector<64x16xbf16>
    %c0_41 = arith.constant 0 : index
    %c0_42 = arith.constant 0 : index
    %65 = vector.load %arg7[%c0_41, %c0_42] : memref<32x16xf32, #tpu.memory_space<vmem>>, vector<32x16xf32>
    %c2_43 = arith.constant 2 : index
    %c0_44 = arith.constant 0 : index
    %c0_45 = arith.constant 0 : index
    %66 = vector.load %arg5[%c2_43, %c0_44, %c0_45] : memref<4x32x64xbf16, #tpu.memory_space<vmem>>, vector<1x32x64xbf16>
    %67 = vector.shape_cast %66 : vector<1x32x64xbf16> to vector<32x64xbf16>
    %cst_46 = arith.constant dense<0.000000e+00> : vector<32x16xf32>
    %68 = tpu.matmul %67, %64, %cst_46 {dimension_numbers = #tpu.dot_dimension_numbers<[1], [0], [0], [1], [0, 0, 1, 1], [], []>} : vector<32x64xbf16>, vector<64x16xbf16>, vector<32x16xf32> -> vector<32x16xf32>
    %69 = arith.addf %65, %68 : vector<32x16xf32>
    %c0_47 = arith.constant 0 : index
    %c0_48 = arith.constant 0 : index
    %70 = vector.load %arg7[%c0_47, %c0_48] : memref<32x16xf32, #tpu.memory_space<vmem>>, vector<32x16xf32>
    tpu.vector_store %arg7[%c0_47, %c0_48], %69 {strides = array<i32>} : memref<32x16xf32, #tpu.memory_space<vmem>>, vector<32x16xf32>,
    %c0_49 = arith.constant 0 : index
    %c3 = arith.constant 3 : index
    %c0_50 = arith.constant 0 : index
    %c0_51 = arith.constant 0 : index
    %71 = vector.load %arg2[%c0_49, %c3, %c0_50, %c0_51] : memref<1x4x4x16xf32, #tpu.memory_space<vmem>>, vector<1x1x4x16xf32>
    %72 = vector.shape_cast %71 : vector<1x1x4x16xf32> to vector<4x16xf32>
    %73 = arith.truncf %72 : vector<4x16xf32> to vector<4x16xbf16>
    %cst_52 = arith.constant dense<0.000000e+00> : vector<64x16xf32>
    %74 = tpu.matmul %2, %73, %cst_52 {dimension_numbers = #tpu.dot_dimension_numbers<[1], [0], [0], [1], [0, 0, 1, 1], [], []>} : vector<64x4xbf16>, vector<4x16xbf16>, vector<64x16xf32> -> vector<64x16xf32>
    %75 = arith.addf %74, %5 : vector<64x16xf32>
    %cst_53 = arith.constant 0.000000e+00 : f32
    %76 = vector.broadcast %cst_53 : f32 to vector<64x16xf32>
    %77 = arith.maximumf %75, %76 : vector<64x16xf32>
    %78 = arith.truncf %77 : vector<64x16xf32> to vector<64x16xbf16>
    %cst_54 = arith.constant dense<0.000000e+00> : vector<64x16xf32>
    %79 = tpu.matmul %10, %78, %cst_54 {dimension_numbers = #tpu.dot_dimension_numbers<[1], [0], [0], [1], [0, 0, 1, 1], [], []>} : vector<64x64xbf16>, vector<64x16xbf16>, vector<64x16xf32> -> vector<64x16xf32>
    %80 = arith.addf %79, %8 : vector<64x16xf32>
    %cst_55 = arith.constant 0.000000e+00 : f32
    %81 = vector.broadcast %cst_55 : f32 to vector<64x16xf32>
    %82 = arith.maximumf %80, %81 : vector<64x16xf32>
    %83 = arith.truncf %82 : vector<64x16xf32> to vector<64x16xbf16>
    %c0_56 = arith.constant 0 : index
    %c0_57 = arith.constant 0 : index
    %84 = vector.load %arg7[%c0_56, %c0_57] : memref<32x16xf32, #tpu.memory_space<vmem>>, vector<32x16xf32>
    %c3_58 = arith.constant 3 : index
    %c0_59 = arith.constant 0 : index
    %c0_60 = arith.constant 0 : index
    %85 = vector.load %arg5[%c3_58, %c0_59, %c0_60] : memref<4x32x64xbf16, #tpu.memory_space<vmem>>, vector<1x32x64xbf16>
    %86 = vector.shape_cast %85 : vector<1x32x64xbf16> to vector<32x64xbf16>
    %cst_61 = arith.constant dense<0.000000e+00> : vector<32x16xf32>
    %87 = tpu.matmul %86, %83, %cst_61 {dimension_numbers = #tpu.dot_dimension_numbers<[1], [0], [0], [1], [0, 0, 1, 1], [], []>} : vector<32x64xbf16>, vector<64x16xbf16>, vector<32x16xf32> -> vector<32x16xf32>
    %88 = arith.addf %84, %87 : vector<32x16xf32>
    %c0_62 = arith.constant 0 : index
    %c0_63 = arith.constant 0 : index
    %89 = vector.load %arg7[%c0_62, %c0_63] : memref<32x16xf32, #tpu.memory_space<vmem>>, vector<32x16xf32>
    tpu.vector_store %arg7[%c0_62, %c0_63], %88 {strides = array<i32>} : memref<32x16xf32, #tpu.memory_space<vmem>>, vector<32x16xf32>,
    %c1_i32 = arith.constant 1 : i32
    %90 = arith.cmpi eq, %arg1, %c1_i32 : i32
    %91 = arith.extui %90 : i1 to i32
    %c0_i32_64 = arith.constant 0 : i32
    %92 = arith.cmpi ne, %91, %c0_i32_64 : i32
    scf.if %92 {
      %c0_65 = arith.constant 0 : index
      %c0_66 = arith.constant 0 : index
      %93 = vector.load %arg7[%c0_65, %c0_66] : memref<32x16xf32, #tpu.memory_space<vmem>>, vector<32x16xf32>
      %94 = arith.truncf %93 : vector<32x16xf32> to vector<32x16xbf16>
      %c0_67 = arith.constant 0 : index
      %c0_68 = arith.constant 0 : index
      %95 = vector.load %arg8[%c0_67, %c0_68] : memref<32x128xbf16, #tpu.memory_space<vmem>>, vector<32x16xbf16>
      tpu.vector_store %arg8[%c0_67, %c0_68], %94 {strides = array<i32>} : memref<32x128xbf16, #tpu.memory_space<vmem>>, vector<32x16xbf16>,
      %96 = tpu.transpose %93, [1, 0] : vector<32x16xf32> -> vector<16x32xf32>
      %97 = arith.truncf %96 : vector<16x32xf32> to vector<16x32xbf16>
      %c0_69 = arith.constant 0 : index
      %c0_70 = arith.constant 0 : index
      %98 = vector.load %arg8[%c0_69, %c0_70] : memref<32x128xbf16, #tpu.memory_space<vmem>>, vector<32x128xbf16>
      %cst_71 = arith.constant dense<0.000000e+00> : vector<16x128xf32>
      %99 = tpu.matmul %97, %98, %cst_71 {dimension_numbers = #tpu.dot_dimension_numbers<[1], [0], [0], [1], [0, 0, 1, 1], [], []>} : vector<16x32xbf16>, vector<32x128xbf16>, vector<16x128xf32> -> vector<16x128xf32>
      %c0_72 = arith.constant 0 : index
      %c0_73 = arith.constant 0 : index
      %c0_74 = arith.constant 0 : index
      %100 = vector.load %arg6[%c0_72, %c0_73, %c0_74] : memref<1x16x128xf32, #tpu.memory_space<vmem>>, vector<1x16x128xf32>
      %101 = vector.shape_cast %100 : vector<1x16x128xf32> to vector<16x128xf32>
      %102 = vector.shape_cast %99 : vector<16x128xf32> to vector<1x16x128xf32>
      tpu.vector_store %arg6[%c0_72, %c0_73, %c0_74], %102 {strides = array<i32>} : memref<1x16x128xf32, #tpu.memory_space<vmem>>, vector<1x16x128xf32>,
    } else {
    }
    return
  }
  func.func @transform_0(%arg0: i32, %arg1: i32) -> (i32, i32, i32, i32) {
    %c0_i32 = arith.constant 0 : i32
    %c0_i32_0 = arith.constant 0 : i32
    %c0_i32_1 = arith.constant 0 : i32
    return %arg0, %arg1, %c0_i32, %c0_i32_0 : i32, i32, i32, i32
  }
  func.func @transform_1(%arg0: i32, %arg1: i32) -> (i32, i32) {
    %c0_i32 = arith.constant 0 : i32
    %c0_i32_0 = arith.constant 0 : i32
    %c0_i32_1 = arith.constant 0 : i32
    return %c0_i32, %c0_i32_0 : i32, i32
  }
  func.func @transform_2(%arg0: i32, %arg1: i32) -> (i32, i32) {
    %c0_i32 = arith.constant 0 : i32
    %c0_i32_0 = arith.constant 0 : i32
    %c0_i32_1 = arith.constant 0 : i32
    return %c0_i32, %c0_i32_0 : i32, i32
  }
  func.func @transform_3(%arg0: i32, %arg1: i32) -> (i32, i32, i32) {
    %c0_i32 = arith.constant 0 : i32
    %c0_i32_0 = arith.constant 0 : i32
    %c0_i32_1 = arith.constant 0 : i32
    return %arg1, %c0_i32, %c0_i32_0 : i32, i32, i32
  }
  func.func @transform_4(%arg0: i32, %arg1: i32) -> (i32, i32, i32) {
    %c0_i32 = arith.constant 0 : i32
    %c0_i32_0 = arith.constant 0 : i32
    %c0_i32_1 = arith.constant 0 : i32
    return %arg0, %c0_i32, %c0_i32_0 : i32, i32, i32
  }
}

</mosaic_0001>

<bundles_post_ra>
// kernel: tpu_custom_call.1
= control target key start
LH: loop header
LB: loop body
LE: loop exit
PB: predicated region body
PF: predicated region fallthrough
CT: control target
= control target key end

     0   :  { %s2906_s0 = inlined_call_operand.vmem [shape: f32[2,8,4,16], index: 0, kind: input, shape index: {}]   ;;  %s2907_s1 = inlined_call_operand.vmem [shape: f32[64,7], index: 1, kind: input, shape index: {}]   ;;  %s2908_s2 = inlined_call_operand.hbm [shape: bf16[64,64], index: 2, kind: input, shape index: {}]   ;;  %s2909_s3 = inlined_call_operand.hbm [shape: bf16[8,32,64], index: 3, kind: input, shape index: {}]   ;;  %s2910_s4 = inlined_call_operand.hbm [shape: f32[2,16,128], index: 4, kind: output, shape index: {}]  }
   0x1   :  { %2921 = sst [smem:[#allocation18_spill]] %s2908_s2 }
   0x2   :  { %2922 = sst [smem:[#allocation19_spill]] %s2910_s4 }
   0x3   :  { %9 = vsyncpa [#allocation5], 0 }
   0x4   :  { %10 = vsyncpa [#allocation8], 0 }
   0x5   :  { %12 = vsyncpa [#allocation8 + $0x1], 0 }
   0x6   :  { %13 = vsyncpa [#allocation6], 0 }
   0x7   :  { %15 = vsyncpa [#allocation6 + $0x1], 0  ;;  %s2374_s15 = smov 0   ;;  %s2376_s16 = smov 0  }
   0x8   :  { %s2378_s17 = smov 0   ;;  %s2380_s18 = smov 0  }
   0x9   :  { %s2382_s19 = smov 0   ;;  %s2384_s20 = smov 0  }
   0xa   :  { %s2386_s21 = smov 0   ;;  %s2388_s22 = smov 0  }
   0xb   :  { %s2390_s23 = smov 0   ;;  %s2392_s24 = smov 0  }
   0xc   :  { %s2394_s25 = smov 0  }
   0xd LB: > { %2923 = sst [smem:[#allocation13_spill]] %s2294_s15  ;;  %s1670_s26 = sadd.s32 4294967295, %s2334_s25   ;;  %s2334_s25 = sphi %s2394_s25, %s21_s25   ;;  %s2330_s24 = sphi %s2392_s24, %s2955_s24   ;;  %s2326_s23 = sphi %s2390_s23, %s2954_s23   ;;  %s2322_s22 = sphi %s2388_s22, %s2953_s22   ;;  %s2318_s21 = sphi %s2386_s21, %s2952_s21   ;;  %s2314_s20 = sphi %s2384_s20, %s2951_s20   ;;  %s2310_s19 = sphi %s2382_s19, %s2950_s19   ;;  %s2306_s18 = sphi %s2380_s18, %s2949_s18   ;;  %s2302_s17 = sphi %s2378_s17, %s2948_s17   ;;  %s2298_s16 = sphi %s2376_s16, %s2947_s16   ;;  %s2294_s15 = sphi %s2374_s15, %s2946_s15  }
   0xe   : > { %2924 = sst [smem:[#allocation14_spill]] %s2334_s25  ;;  %s1671_s27 = sadd.s32 4294967294, %s2334_s25  }
   0xf   : > { %p123_p0 = scmp.ne.s32.totalorder %s2310_s19, %s2306_s18  ;;  %p2430_p1 = scmp.eq.s32.totalorder %s1670_s26, 0 }
  0x10   : > { %s136_s29 = sadd.s32 1, %s2302_s17  ;;  %p146_p2 = scmp.ne.s32.totalorder %s2302_s17, %s2298_s16 }
  0x11   : > { %p2439_p3 = por %p2430_p1, %p123_p0  ;;  %p147_p4 = scmp.eq.s32.totalorder %s1670_s26, 3 }
  0x12   : > { %p152_p5 = scmp.ne.s32.totalorder %s2298_s16, %s2294_s15  ;;  %p153_p6 = scmp.eq.s32.totalorder %s1671_s27, 3 }
  0x13   : > { %p2445_p7 = por %p147_p4, %p146_p2  ;;  %p1672_p8 = scmp.ge.s32.totalorder %s2334_s25, 1 }
  0x14   : > { %p2450_p9 = por %p153_p6, %p152_p5  ;;  %p160_p10 = scmp.lt.s32.totalorder %s2334_s25, 5 }
  0x15   : > { %s2927_s5 = scalar_select %p2445_p7, 1, 0 }
  0x16   : > { %s2928_s6 = scalar_select %p2450_p9, 1, 0 }
  0x17   : > { %p2455_p11 = pnand %p1672_p8, %p160_p10  ;;  %s2336_s8 = smov [#allocation4]  }
  0x18   : > { %2929 = sst [smem:[#allocation15_spill]] %s2928_s6  ;;  %s175_s9 = sshll.u32 %s2336_s8, 4  ;;  %s176_s9 = int_to_ptr.vmem [resolvable:$true] %s175_s9 }
  0x19   : > { %p2025_p12 = pneg %p2455_p11  ;;  %s2167_s10 = scalar_lea.vmem %s176_s9, 512 }
  0x1a   : > { %p2168_p2 = scmp.ne.s32.totalorder %s176_s9, %s2167_s10  ;;  %p2175_p6 = scmp.lt.s32.totalorder %s176_s9, %s176_s9 }
  0x1b   : > { %p2026_p13 = pnand %p2025_p12, %p2430_p1  ;;  %p2176_p9 = scmp.lt.s32.totalorder %s2167_s10, %s2167_s10 }
  0x1d   : > { %p2158_p0 = pneg %p2026_p13  ;;  %p2177_p7 = por %p2176_p9, %p2175_p6 }
  0x1f   : > { %p2170_p4 = pnand %p2168_p2, %p2158_p0 }
  0x21   : > { %p2171_p5 = pneg %p2170_p4 }
  0x23   : > { %p2178_p8 = pnand %p2177_p7, %p2171_p5 }
  0x25   : > { %2181 = shalt.err (!%p2178_p8)
}
  0x26   : > { %s2912_s11 = smov 64   ;;  %s2913_s12 = smov 4  }
  0x27   : > { %s2931_s2 = sld [smem:[#allocation18_spill]]  ;;  %s30_s18 = sadd.s32 1, %s2326_s23 }
  0x28   : > { %p31_p7 = scmp.ge.s32.totalorder %s30_s18, 2  ;;  %s33_s26 = sadd.s32 1, %s2330_s24 }
  0x29   : > { %s110_s27 = sadd.s32 1, %s2314_s20  ;;  %p117_p9 = scmp.ne.s32.totalorder %s2314_s20, %s2310_s19 }
  0x2a   : > { %s2957_s18 = smov (%p31_p7, %s30_s18), 0  ;;  %s2959_s26 = smov (!%p31_p7, %s33_s26), %s2330_s24 }
  0x2b   : > { %2932 = sst [smem:[#allocation16_spill]] %s2957_s18  ;;  %s107_s8 = ssub.s32 %s2326_s23, %s2957_s18 }
  0x2c   : > { %p118_p10 = scmp.eq.s32.totalorder %s2334_s25, 0  ;;  %p35_p12 = scmp.ge.s32.totalorder %s2959_s26, 2 }
  0x2d   : > { %2028 = dma.hbm_to_vmem [thread:$0]  (!%p2026_p13), %s2931_s2, 512, %s176_s9, [#allocation5], %s2912_s11, %s2912_s11, %s2913_s12  }
  0x2e   : > { %p108_p0 = scmp.eq.s32.totalorder %s107_s8, 0  ;;  %p2480_p2 = por %p118_p10, %p117_p9 }
  0x2f   : > { %p2038_p13 = scmp.lt.s32.totalorder %s2334_s25, 4  ;;  %s2961_s26 = smov (%p35_p12, %s2959_s26), 0 }
  0x30   : > { %2934 = sst [smem:[#allocation17_spill]] %s2961_s26  ;;  %s133_s13 = ssub.s32 %s2330_s24, %s2961_s26 }
  0x31   : > { %s2488_s10 = scalar_select %p108_p0, %s2314_s20, %s110_s27  }
  0x32   : > { %s202_s14 = sand.u32 1, %s2314_s20   ;;  %p134_p4 = scmp.eq.s32.totalorder %s133_s13, 0 }
  0x33   : > { %s1675_s11 = sshll.u32 %s202_s14, 6  ;;  %s1768_s12 = sshll.u32 %s2326_s23, 10 }
  0x34   : > { %s2497_s2 = scalar_select %p134_p4, %s2302_s17, %s136_s29  }
  0x35   : > { %s213_s6 = scalar_lea.hbm %s2909_s3, %s1768_s12  ;;  %s206_s15 = scalar_lea.vmem [#allocation7], %s1675_s11 }
  0x36   : > { %s214_s4 = sshll.u32 %s206_s15, 4  ;;  %p2504_p5 = pnand %p2038_p13, %p2480_p2  ;;  %s215_s4 = int_to_ptr.vmem [resolvable:$true] %s214_s4 }
  0x37   : > { %s203_s27 = scalar_lea.sflag [#allocation8], %s202_s14  ;;  %s2195_s13 = scalar_lea.vmem %s215_s4, 1024 }
  0x38   : > { %p2184_p6 = pneg %p2504_p5  ;;  %p2196_p8 = scmp.ne.s32.totalorder %s215_s4, %s2195_s13 }
  0x39   : > { %s2339_s29 = smov [#allocation7]  }
  0x3a   : > { %p2198_p7 = pnand %p2196_p8, %p2184_p6  ;;  %s2200_s26 = sshll.u32 %s2339_s29, 4  ;;  %s2201_s26 = int_to_ptr.vmem [resolvable:$false] %s2200_s26 }
  0x3b   : > { %s2202_s12 = scalar_lea.vmem %s2201_s26, 2048  ;;  %p2203_p10 = scmp.lt.s32.totalorder %s215_s4, %s2201_s26 }
  0x3c   : > { %p2199_p9 = pneg %p2198_p7  ;;  %p2204_p12 = scmp.lt.s32.totalorder %s2202_s12, %s2195_s13 }
  0x3e   : > { %p2205_p0 = por %p2204_p12, %p2203_p10 }
  0x40   : > { %p2206_p2 = pnand %p2205_p0, %p2199_p9 }
  0x42   : > { %2209 = shalt.err (!%p2206_p2)
}
  0x43   : > { %s2936_s15 = smov 4   ;;  %s2937_s11 = smov 64  }
  0x44   : > { %2032 = dma.hbm_to_vmem [thread:$0]  (!%p2504_p5), %s213_s6, 1024, %s215_s4, %s203_s27, %s2937_s11, %s2937_s11, %s2936_s15  }
  0x45   : > { %226 = sbr.rel (%p2455_p11) target bundleno = 2556 (0x9fc), region = 36 }
  0x4a   : > { %2281 = dma.done.wait (%p2430_p1), [#allocation5], 512  }
  0x4b   : > { %2283 = vsyncadd (%p2430_p1), [#allocation5], 4294966784  ;;  %s232_s18 = sand.u32 1, %s2310_s19  }
  0x4c   : > { %s1681_s26 = sshll.u32 %s232_s18, 6  ;;  %s233_s9 = scalar_lea.sflag [#allocation8], %s232_s18 }
  0x4d   : > { %s2522_s14 = scalar_lea.vmem [#allocation7], %s1681_s26 }
  0x4e   : > { %2285 = dma.done.wait (%p2439_p3), %s233_s9, 1024  }
  0x4f   : > { %2287 = vsyncadd (%p2439_p3), %s233_s9, 4294966272  ;;  %v2340_v0 = vmov 4   ;;  %v2528_v1 = vld [vmem:[#allocation4] sm:$0xf]  ;;  %v2530_v2 = vld [vmem:[#allocation4 + $0x4] sm:$0xf] }
  0x50   : > { %2141 = vset.pattern.permute.xlu1 %v2340_v0  ;;  %2140 = vset.pattern.permute.xlu0 %v2340_v0  ;;  %v2532_v3 = vld [vmem:[#allocation4 + $0x8] sm:$0xf]  ;;  %v2534_v4 = vld [vmem:[#allocation4 + $0xc] sm:$0xf]  ;;  %v2536_v5 = vld [vmem:[#allocation4 + $0x10] sm:$0xf] }
  0x51   : > { %v2538_v6 = vld [vmem:[#allocation4 + $0x14] sm:$0xf]  ;;  %v2540_v7 = vld [vmem:[#allocation4 + $0x18] sm:$0xf]  ;;  %v2542_v8 = vld [vmem:[#allocation4 + $0x1c] sm:$0xf] }
  0x52   : > { %v2547_v9 = vld [vmem:[%s2907_s1 + $0x10] sm:$0xff]  ;;  %v282_v10 = vld [vmem:[%s2907_s1] sm:$0xff]  ;;  %v2556_v11 = vld [vmem:[%s2907_s1 + $0x18] sm:$0xff]  ;;  %v2341_v21 = vmov 5   ;;  %s1683_s4 = sshll.u32 %s2318_s21, 2  ;;  %p271_p1 = scmp.lt.s32.totalorder %s2322_s22, 1 }
  0x53   : > { %306 = vperm.xlu1 %2141, %v2547_v9   ;;  %v2561_v12 = vld [vmem:[%s2907_s1 + $0x8] sm:$0xff]  ;;  %296 = vperm.xlu0 %2140, %v282_v10   ;;  %v2565_v13 = vpack.c.bf16 %v2556_v11, %v2547_v9  ;;  %v286_v16 = vld [vmem:[%s2907_s1 + $0x20] sm:$0xff]  ;;  %v289_v18 = vld [vmem:[%s2907_s1 + $0x38] sm:$0xff]  ;;  %p273_p3 = scmp.lt.s32.totalorder %s1683_s4, 7  ;;  %s267_s30 = sand.u32 1, %s2298_s16  }
  0x54   : > { %v2568_v14 = vpack.c.bf16 %v2561_v12, %v282_v10  ;;  %v287_v15 = vld [vmem:[%s2907_s1 + $0x28] sm:$0xff]  ;;  %v288_v19 = vld [vmem:[%s2907_s1 + $0x30] sm:$0xff]  ;;  %s272_s25 = scalar_select %p271_p1, %s2322_s22, 1 }
  0x55   : > { %v2576_v17 = vpack.c.bf16 %v287_v15, %v286_v16  ;;  %v2584_v20 = vpack.c.bf16 %v289_v18, %v288_v19  ;;  %s2963_s4 = smov (!%p273_p3, %s1683_s4), 7  ;;  %s1682_s7 = sshll.u32 %s267_s30, 4 }
  0x56   : > { %s1684_s28 = sshll.u32 %s272_s25, 3  ;;  %s2634_s12 = scalar_lea.vmem [#allocation9], %s1682_s7 }
  0x57   : > { %311 = vperm.xlu1 %2141, %v2556_v11   ;;  %301 = vperm.xlu0 %2140, %v2561_v12   ;;  %s276_s6 = sadd.s32 %s1684_s28, %s2963_s4  ;;  %p1686_p11 = scmp.ne.s32.totalorder %s2318_s21, 0 }
  0x58   : > { %s1685_s8 = sshll.u32 %s276_s6, 2 }
  0x59   : > { %s2600_s29 = scalar_lea.vmem %s2906_s0, %s1685_s8 }
  0x5b   : > { %321 = vperm.xlu1 %2141, %v287_v15   ;;  %316 = vperm.xlu0 %2140, %v286_v16  }
  0x5f   : > { %331 = vperm.xlu1 %2141, %v289_v18   ;;  %326 = vperm.xlu0 %2140, %v288_v19  }
  0x63   : > { %2143 = vset.pattern.permute.xlu1 %v2341_v21  ;;  %2142 = vset.pattern.permute.xlu0 %v2341_v21 }
  0x64   : > { %339 = vperm.xlu1 %2143, %v2561_v12   ;;  %335 = vperm.xlu0 %2142, %v282_v10  }
  0x68   : > { %343 = vperm.xlu1 %2143, %v2547_v9   ;;  %347 = vperm.xlu0 %2142, %v2556_v11  }
  0x6c   : > { %351 = vperm.xlu1 %2143, %v286_v16   ;;  %355 = vperm.xlu0 %2142, %v287_v15  }
  0x70   : > { %359 = vperm.xlu1 %2143, %v288_v19   ;;  %363 = vperm.xlu0 %2142, %v289_v18  }
  0xce   : > { %v2602_v22 = vpop.permute.xlu1 %306  ;;  %v2604_v23 = vpop.permute.xlu0 %296 }
  0xd2   : > { %v2606_v24 = vpop.permute.xlu1 %311  ;;  %v2608_v25 = vpop.permute.xlu0 %301 }
  0xd6   : > { %v2610_v26 = vpop.permute.xlu1 %321  ;;  %v2612_v27 = vpop.permute.xlu0 %316 }
  0xda   : > { %v2614_v28 = vpop.permute.xlu1 %331  ;;  %v2616_v29 = vpop.permute.xlu0 %326 }
  0xdf   : > { %v2618_v30 = vpop.permute.xlu1 %339  ;;  %v2620_v31 = vpop.permute.xlu0 %335 }
  0xe3   : > { %v2622_v32 = vpop.permute.xlu1 %343  ;;  %v2624_v33 = vpop.permute.xlu0 %347 }
  0xe7   : > { %v2626_v34 = vpop.permute.xlu1 %351  ;;  %v2628_v35 = vpop.permute.xlu0 %355  ;;  %377 = sbr.rel (%p1686_p11) target bundleno = 367 (0x16f), region = 48 }
  0xeb   : > { %v2630_v36 = vpop.permute.xlu1 %359  ;;  %v2632_v37 = vpop.permute.xlu0 %363 }
  0xec   : > { %v2342_v38 = vmov 6   ;;  %v2343_v39 = vmov 0   ;;  %vm394_vm0 = vcmask 130048  }
  0xed   : > { %2145 = vset.pattern.permute.xlu1 %v2342_v38  ;;  %2144 = vset.pattern.permute.xlu0 %v2342_v38  ;;  %399 = vst [vmem:[#allocation3] sm:$0xf] %v2343_v39  ;;  %400 = vst [vmem:[#allocation3 + $0x4] sm:$0xf] %v2343_v39 }
  0xee   : > { %387 = vperm.xlu1 %2145, %v2547_v9   ;;  %379 = vperm.xlu0 %2144, %v282_v10   ;;  %401 = vst [vmem:[#allocation3 + $0x8] sm:$0xf] %v2343_v39  ;;  %402 = vst [vmem:[#allocation3 + $0xc] sm:$0xf] %v2343_v39 }
  0xf2   : > { %391 = vperm.xlu1 %2145, %v2556_v11   ;;  %383 = vperm.xlu0 %2144, %v2561_v12  }
 0x169   : > { %v388_v40 = vpop.permute.xlu1 %387  ;;  %v380_v41 = vpop.permute.xlu0 %379 }
 0x16a   : > { %397 = vst.msk [vmem:[#allocation2 + $0x10] sm:$0xff] %vm394_vm0, %v388_v40  ;;  %395 = vst.msk [vmem:[#allocation2] sm:$0xff] %vm394_vm0, %v380_v41 }
 0x16d   : > { %v392_v42 = vpop.permute.xlu1 %391  ;;  %v384_v43 = vpop.permute.xlu0 %383 }
 0x16e   : > { %398 = vst.msk [vmem:[#allocation2 + $0x18] sm:$0xff] %vm394_vm0, %v392_v42  ;;  %396 = vst.msk [vmem:[#allocation2 + $0x8] sm:$0xff] %vm394_vm0, %v384_v43 }
 0x16f PF: > { %v403_v44 = vld [vmem:[%s2600_s29] sm:$0xf]  ;;  %vm418_vm1 = vcmask 1041408   ;;  %vm405_vm2 = vcmask 31744   ;;  %v2653_v47 = vcombine.low %v2528_v1, %v2530_v2  ;;  %vm519_vm3 = vcmask 523264   ;;  %p1754_p13 = scmp.ne.s32.totalorder %s2318_s21, 1 }
 0x170   : > { %v404_v45 = vpack.c.bf16 %v403_v44, %v403_v44  ;;  %1855 = vmatprep.mubr.msk.bf16.mxu0 %vm405_vm2, %v2568_v14  ;;  %v2667_v38 = vcombine.low %v2532_v3, %v2534_v4  ;;  %v2671_v39 = vcombine.low %v2536_v5, %v2538_v6  ;;  %v2679_v40 = vcombine.low %v2540_v7, %v2542_v8  ;;  %v2146_v3 = vld [vmem:[%s2522_s14] sm:$0xff]  }
 0x171   : > { %1871 = vmatprep.mubr.msk.bf16.mxu1 %vm519_vm3, %v2653_v47  ;;  %vm686_vm4 = vcmask 130048  }
 0x172   : > { %2013 = vmatprep.subr.msk.bf16.mxu0 %vm418_vm1, %v404_v45  ;;  %v420_v46 = vsel %vm418_vm1, %v404_v45, 0 }
 0x173   : > { %1854 = vmatpush3.bf16.msra.mxu0 %v420_v46 }
 0x176   : > { %1856 = vmatmul.mubr.msk.bf16.vlgmr.msra.gmra.mxu0 %vm405_vm2, %v2565_v13 }
 0x177   : > { %1859 = vmatprep.mubr.msk.bf16.mxu0 %vm405_vm2, %v2576_v17 }
 0x17e   : > { %1860 = vmatmul.mubr.msk.bf16.gmra.mxu0 %vm405_vm2, %v2584_v20 }
 0x17f   : > { %1887 = vmatprep.mubr.msk.bf16.mxu0 %vm519_vm3, %v2146_v3 }
 0x236   : > { %v1857_v48 = vpop.f32.mrf.mxu0 }
 0x237   : > { %v465_v63 = vadd.f32 %v1857_v48, %v2602_v22 }
 0x238   : > { %v456_v49 = vpop.f32.mrf.mxu0 }
 0x239   : > { %v489_v12 = vmax.f32 %v465_v63, 0.0  ;;  %v457_v15 = vadd.f32 %v456_v49, %v2604_v23 }
 0x23a   : > { %v1858_v50 = vpop.f32.mrf.mxu0 }
 0x23b   : > { %v468_v59 = vadd.f32 %v1858_v50, %v2606_v24  ;;  %v487_v19 = vmax.f32 %v457_v15, 0.0  ;;  %v609_v15 = vld [vmem:[#allocation2] sm:$0xff] }
 0x23c   : > { %v459_v51 = vpop.f32.mrf.mxu0 }
 0x23d   : > { %v490_v9 = vmax.f32 %v468_v59, 0.0  ;;  %v460_v10 = vadd.f32 %v459_v51, %v2608_v25 }
 0x23e   : > { %v1861_v52 = vpop.f32.mrf.mxu0 }
 0x23f   : > { %v481_v54 = vadd.f32 %v1861_v52, %v2616_v29  ;;  %v496_v16 = vpack.c.bf16 %v490_v9, %v489_v12  ;;  %v488_v18 = vmax.f32 %v460_v10, 0.0  ;;  %v2147_v9 = vld [vmem:[%s2522_s14 + $0x8] sm:$0xff]  }
 0x240   : > { %v472_v53 = vpop.f32.mrf.mxu0 }
 0x241   : > { %v473_v56 = vadd.f32 %v472_v53, %v2612_v27  ;;  %v493_v60 = vmax.f32 %v481_v54, 0.0  ;;  %v495_v21 = vpack.c.bf16 %v488_v18, %v487_v19  ;;  %v612_v19 = vld [vmem:[#allocation2 + $0x18] sm:$0xff] }
 0x242   : > { %v1862_v55 = vpop.f32.mrf.mxu0 }
 0x243   : > { %v484_v57 = vadd.f32 %v1862_v55, %v2614_v28  ;;  %v491_v0 = vmax.f32 %v473_v56, 0.0 }
 0x244   : > { %v475_v58 = vpop.f32.mrf.mxu0 }
 0x245   : > { %v494_v61 = vmax.f32 %v484_v57, 0.0  ;;  %v476_v62 = vadd.f32 %v475_v58, %v2610_v26 }
 0x247   : > { %v492_v1 = vmax.f32 %v476_v62, 0.0  ;;  %v498_v2 = vpack.c.bf16 %v494_v61, %v493_v60 }
 0x249   : > { %v497_v11 = vpack.c.bf16 %v492_v1, %v491_v0  ;;  %1863 = vmatprep.subr.bf16.mxu1 %v498_v2  ;;  %v1703_v0 = vld [vmem:[%s2600_s29 + $0x4] sm:$0xf] }
 0x24a   : > { %1864 = vmatpush3.bf16.msra.mxu1 %v498_v2  ;;  %v693_v2 = vpack.c.bf16 %v1703_v0, %v1703_v0 }
 0x24b   : > { %1865 = vmatprep.subr.bf16.mxu1 %v497_v11 }
 0x24c   : > { %v695_v10 = vsel %vm418_vm1, %v693_v2, 0 }
 0x24e   : > { %1866 = vmatpush3.bf16.msra.mxu1 %v497_v11  ;;  %v611_v11 = vld [vmem:[#allocation2 + $0x10] sm:$0xff] }
 0x24f   : > { %1867 = vmatprep.subr.bf16.mxu1 %v496_v16 }
 0x252   : > { %1868 = vmatpush3.bf16.msra.mxu1 %v496_v16 }
 0x253   : > { %1869 = vmatprep.subr.bf16.mxu1 %v495_v21 }
 0x256   : > { %1870 = vmatpush3.bf16.msra.mxu1 %v495_v21 }
 0x259   : > { %1872 = vmatmul.mubr.msk.bf16.vlgmr.msra.gmra.mxu1 %vm519_vm3, %v2667_v38 }
 0x25a   : > { %1875 = vmatprep.mubr.msk.bf16.mxu1 %vm519_vm3, %v2671_v39 }
 0x261   : > { %1876 = vmatmul.mubr.msk.bf16.gmra.mxu1 %vm519_vm3, %v2679_v40 }
 0x262   : > { %1909 = vmatprep.mubr.msk.bf16.mxu1 %vm519_vm3, %v2653_v47 }
 0x319   : > { %v1873_v4 = vpop.f32.mrf.mxu1 }
 0x31a   : > { %v575_v52 = vadd.f32 %v1873_v4, %v2622_v32  ;;  %v610_v4 = vld [vmem:[#allocation2 + $0x8] sm:$0xff] }
 0x31b   : > { %v566_v5 = vpop.f32.mrf.mxu1 }
 0x31c   : > { %v599_v59 = vmax.f32 %v575_v52, 0.0  ;;  %v567_v60 = vadd.f32 %v566_v5, %v2620_v31 }
 0x31d   : > { %v1874_v6 = vpop.f32.mrf.mxu1 }
 0x31e   : > { %v578_v48 = vadd.f32 %v1874_v6, %v2624_v33  ;;  %v597_v63 = vmax.f32 %v567_v60, 0.0 }
 0x31f   : > { %v569_v41 = vpop.f32.mrf.mxu1 }
 0x320   : > { %v600_v56 = vmax.f32 %v578_v48, 0.0  ;;  %v570_v57 = vadd.f32 %v569_v41, %v2618_v30 }
 0x321   : > { %v1877_v42 = vpop.f32.mrf.mxu1 }
 0x322   : > { %v591_v44 = vadd.f32 %v1877_v42, %v2630_v36  ;;  %v606_v61 = vpack.c.bf16 %v600_v56, %v599_v59  ;;  %v598_v62 = vmax.f32 %v570_v57, 0.0 }
 0x323   : > { %v582_v43 = vpop.f32.mrf.mxu1 }
 0x324   : > { %v583_v7 = vadd.f32 %v582_v43, %v2626_v34  ;;  %v603_v49 = vmax.f32 %v591_v44, 0.0  ;;  %v605_v1 = vpack.c.bf16 %v598_v62, %v597_v63 }
 0x325   : > { %v1878_v45 = vpop.f32.mrf.mxu1 }
 0x326   : > { %v594_v8 = vadd.f32 %v1878_v45, %v2632_v37  ;;  %v601_v53 = vmax.f32 %v583_v7, 0.0 }
 0x327   : > { %v585_v46 = vpop.f32.mrf.mxu1 }
 0x328   : > { %v604_v50 = vmax.f32 %v594_v8, 0.0  ;;  %v586_v51 = vadd.f32 %v585_v46, %v2628_v35 }
 0x32a   : > { %v608_v54 = vpack.c.bf16 %v604_v50, %v603_v49  ;;  %v602_v55 = vmax.f32 %v586_v51, 0.0 }
 0x32c   : > { %v607_v58 = vpack.c.bf16 %v602_v55, %v601_v53  ;;  %1879 = vmatprep.subr.bf16.mxu0 %v608_v54 }
 0x32d   : > { %1880 = vmatpush3.bf16.msra.mxu0 %v608_v54 }
 0x32e   : > { %1881 = vmatprep.subr.bf16.mxu0 %v607_v58 }
 0x331   : > { %1882 = vmatpush3.bf16.msra.mxu0 %v607_v58 }
 0x332   : > { %1883 = vmatprep.subr.bf16.mxu0 %v606_v61 }
 0x335   : > { %1884 = vmatpush3.bf16.msra.mxu0 %v606_v61 }
 0x336   : > { %1885 = vmatprep.subr.bf16.mxu0 %v605_v1 }
 0x339   : > { %1886 = vmatpush3.bf16.msra.mxu0 %v605_v1 }
 0x33a   : > { %2014 = vmatprep.subr.msk.bf16.mxu0 %vm418_vm1, %v693_v2 }
 0x33c   : > { %1888 = vmatmul.mubr.msk.bf16.vlgmr.msra.gmra.mxu0 %vm519_vm3, %v2147_v9 }
 0x33d   : > { %1892 = vmatpush3.bf16.msra.mxu0 %v695_v10  ;;  %1893 = vmatprep.mubr.msk.bf16.mxu0 %vm405_vm2, %v2568_v14  ;;  %v1720_v10 = vld [vmem:[%s2600_s29 + $0x8] sm:$0xf] }
 0x344   : > { %1894 = vmatmul.mubr.msk.bf16.vlgmr.msra.gmra.mxu0 %vm405_vm2, %v2565_v13 }
 0x345   : > { %1897 = vmatprep.mubr.msk.bf16.mxu0 %vm405_vm2, %v2576_v17 }
 0x34c   : > { %1898 = vmatmul.mubr.msk.bf16.gmra.mxu0 %vm405_vm2, %v2584_v20 }
 0x3fc   : > { %v1889_v12 = vpop.f32.mrf.mxu0 }
 0x3fd   : > { %v684_v16 = vadd.f32 %v1889_v12, %v611_v11  ;;  %v935_v12 = vpack.c.bf16 %v1720_v10, %v1720_v10 }
 0x3fe   : > { %v667_v18 = vpop.f32.mrf.mxu0 }
 0x3ff   : > { %689 = vst.msk [vmem:[#allocation2 + $0x10] sm:$0xff] %vm686_vm4, %v684_v16  ;;  %v682_v21 = vadd.f32 %v667_v18, %v609_v15  ;;  %v937_v15 = vsel %vm418_vm1, %v935_v12, 0  ;;  %v2148_v16 = vld [vmem:[%s2522_s14 + $0x10] sm:$0xff]  }
 0x400   : > { %v1890_v3 = vpop.f32.mrf.mxu0  ;;  %1925 = vmatprep.mubr.msk.bf16.mxu0 %vm519_vm3, %v2148_v16 }
 0x401   : > { %687 = vst.msk [vmem:[#allocation2] sm:$0xff] %vm686_vm4, %v682_v21  ;;  %v685_v5 = vadd.f32 %v1890_v3, %v612_v19 }
 0x402   : > { %v670_v6 = vpop.f32.mrf.mxu0 }
 0x403   : > { %690 = vst.msk [vmem:[#allocation2 + $0x18] sm:$0xff] %vm686_vm4, %v685_v5  ;;  %v683_v41 = vadd.f32 %v670_v6, %v610_v4 }
 0x404   : > { %v1895_v42 = vpop.f32.mrf.mxu0 }
 0x405   : > { %688 = vst.msk [vmem:[#allocation2 + $0x8] sm:$0xff] %vm686_vm4, %v683_v41  ;;  %v740_v56 = vadd.f32 %v1895_v42, %v2602_v22 }
 0x406   : > { %v731_v43 = vpop.f32.mrf.mxu0 }
 0x407   : > { %v764_v63 = vmax.f32 %v740_v56, 0.0  ;;  %v732_v0 = vadd.f32 %v731_v43, %v2604_v23 }
 0x408   : > { %v1896_v44 = vpop.f32.mrf.mxu0 }
 0x409   : > { %v743_v52 = vadd.f32 %v1896_v44, %v2606_v24  ;;  %v762_v9 = vmax.f32 %v732_v0, 0.0 }
 0x40a   : > { %v734_v45 = vpop.f32.mrf.mxu0 }
 0x40b   : > { %v765_v60 = vmax.f32 %v743_v52, 0.0  ;;  %v735_v61 = vadd.f32 %v734_v45, %v2608_v25 }
 0x40c   : > { %v1899_v7 = vpop.f32.mrf.mxu0 }
 0x40d   : > { %v756_v46 = vadd.f32 %v1899_v7, %v2616_v29  ;;  %v771_v1 = vpack.c.bf16 %v765_v60, %v764_v63  ;;  %v763_v2 = vmax.f32 %v735_v61, 0.0 }
 0x40e   : > { %v747_v8 = vpop.f32.mrf.mxu0 }
 0x40f   : > { %v748_v49 = vadd.f32 %v747_v8, %v2612_v27  ;;  %v768_v53 = vmax.f32 %v756_v46, 0.0  ;;  %v770_v11 = vpack.c.bf16 %v763_v2, %v762_v9 }
 0x410   : > { %v1900_v48 = vpop.f32.mrf.mxu0 }
 0x411   : > { %v759_v50 = vadd.f32 %v1900_v48, %v2614_v28  ;;  %v766_v57 = vmax.f32 %v748_v49, 0.0 }
 0x412   : > { %v750_v51 = vpop.f32.mrf.mxu0 }
 0x413   : > { %v769_v54 = vmax.f32 %v759_v50, 0.0  ;;  %v751_v55 = vadd.f32 %v750_v51, %v2610_v26 }
 0x415   : > { %v773_v58 = vpack.c.bf16 %v769_v54, %v768_v53  ;;  %v767_v59 = vmax.f32 %v751_v55, 0.0 }
 0x417   : > { %v772_v62 = vpack.c.bf16 %v767_v59, %v766_v57  ;;  %1901 = vmatprep.subr.bf16.mxu1 %v773_v58 }
 0x418   : > { %1902 = vmatpush3.bf16.msra.mxu1 %v773_v58 }
 0x419   : > { %1903 = vmatprep.subr.bf16.mxu1 %v772_v62 }
 0x41c   : > { %1904 = vmatpush3.bf16.msra.mxu1 %v772_v62 }
 0x41d   : > { %1905 = vmatprep.subr.bf16.mxu1 %v771_v1 }
 0x420   : > { %1906 = vmatpush3.bf16.msra.mxu1 %v771_v1 }
 0x421   : > { %1907 = vmatprep.subr.bf16.mxu1 %v770_v11 }
 0x424   : > { %1908 = vmatpush3.bf16.msra.mxu1 %v770_v11 }
 0x425   : > { %2015 = vmatprep.subr.msk.bf16.mxu1 %vm418_vm1, %v935_v12 }
 0x427   : > { %1910 = vmatmul.mubr.msk.bf16.vlgmr.msra.gmra.mxu1 %vm519_vm3, %v2667_v38 }
 0x428   : > { %1930 = vmatpush3.bf16.msra.mxu1 %v937_v15  ;;  %1913 = vmatprep.mubr.msk.bf16.mxu1 %vm519_vm3, %v2671_v39 }
 0x42f   : > { %1914 = vmatmul.mubr.msk.bf16.gmra.mxu1 %vm519_vm3, %v2679_v40 }
 0x430   : > { %1931 = vmatprep.mubr.msk.bf16.mxu1 %vm405_vm2, %v2568_v14 }
 0x437   : > { %1932 = vmatmul.mubr.msk.bf16.vlgmr.msra.gmra.mxu1 %vm405_vm2, %v2565_v13 }
 0x438   : > { %1935 = vmatprep.mubr.msk.bf16.mxu1 %vm405_vm2, %v2576_v17 }
 0x43f   : > { %1936 = vmatmul.mubr.msk.bf16.gmra.mxu1 %vm405_vm2, %v2584_v20 }
 0x4e7   : > { %v1911_v18 = vpop.f32.mrf.mxu1 }
 0x4e8   : > { %v817_v49 = vadd.f32 %v1911_v18, %v2622_v32 }
 0x4e9   : > { %v808_v19 = vpop.f32.mrf.mxu1 }
 0x4ea   : > { %v841_v58 = vmax.f32 %v817_v49, 0.0  ;;  %v809_v59 = vadd.f32 %v808_v19, %v2620_v31 }
 0x4eb   : > { %v1912_v21 = vpop.f32.mrf.mxu1 }
 0x4ec   : > { %v820_v45 = vadd.f32 %v1912_v21, %v2624_v33  ;;  %v839_v0 = vmax.f32 %v809_v59, 0.0 }
 0x4ed   : > { %v811_v3 = vpop.f32.mrf.mxu1 }
 0x4ee   : > { %v842_v54 = vmax.f32 %v820_v45, 0.0  ;;  %v812_v55 = vadd.f32 %v811_v3, %v2618_v30  ;;  %v2149_v3 = vld [vmem:[%s2522_s14 + $0x18] sm:$0xff]  }
 0x4ef   : > { %v1915_v4 = vpop.f32.mrf.mxu1 }
 0x4f0   : > { %v833_v6 = vadd.f32 %v1915_v4, %v2630_v36  ;;  %v848_v61 = vpack.c.bf16 %v842_v54, %v841_v58  ;;  %v840_v62 = vmax.f32 %v812_v55, 0.0  ;;  %v851_v54 = vld [vmem:[#allocation2] sm:$0xff] }
 0x4f1   : > { %v824_v5 = vpop.f32.mrf.mxu1 }
 0x4f2   : > { %v825_v42 = vadd.f32 %v824_v5, %v2626_v34  ;;  %v845_v7 = vmax.f32 %v833_v6, 0.0  ;;  %v847_v2 = vpack.c.bf16 %v840_v62, %v839_v0 }
 0x4f3   : > { %v1916_v41 = vpop.f32.mrf.mxu1 }
 0x4f4   : > { %v836_v43 = vadd.f32 %v1916_v41, %v2632_v37  ;;  %v843_v50 = vmax.f32 %v825_v42, 0.0 }
 0x4f5   : > { %v827_v44 = vpop.f32.mrf.mxu1 }
 0x4f6   : > { %v846_v8 = vmax.f32 %v836_v43, 0.0  ;;  %v828_v46 = vadd.f32 %v827_v44, %v2628_v35 }
 0x4f7   : > { %v1933_v48 = vpop.f32.mrf.mxu1 }
 0x4f8   : > { %v850_v51 = vpack.c.bf16 %v846_v8, %v845_v7  ;;  %v844_v52 = vmax.f32 %v828_v46, 0.0  ;;  %v982_v4 = vadd.f32 %v1933_v48, %v2602_v22 }
 0x4f9   : > { %v973_v53 = vpop.f32.mrf.mxu1 }
 0x4fa   : > { %v849_v56 = vpack.c.bf16 %v844_v52, %v843_v50  ;;  %1917 = vmatprep.subr.bf16.mxu0 %v850_v51  ;;  %v1006_v45 = vmax.f32 %v982_v4, 0.0  ;;  %v974_v7 = vadd.f32 %v973_v53, %v2604_v23  ;;  %v2150_v50 = vld [vmem:[%s2522_s14 + $0x20] sm:$0xff]  }
 0x4fb   : > { %1918 = vmatpush3.bf16.msra.mxu0 %v850_v51  ;;  %v1934_v57 = vpop.f32.mrf.mxu1  ;;  %1963 = vmatprep.mubr.msk.bf16.mxu1 %vm519_vm3, %v2150_v50  ;;  %v853_v51 = vld [vmem:[#allocation2 + $0x10] sm:$0xff] }
 0x4fc   : > { %1919 = vmatprep.subr.bf16.mxu0 %v849_v56  ;;  %v985_v16 = vadd.f32 %v1934_v57, %v2606_v24  ;;  %v1004_v48 = vmax.f32 %v974_v7, 0.0  ;;  %v854_v57 = vld [vmem:[#allocation2 + $0x18] sm:$0xff] }
 0x4fd   : > { %v976_v60 = vpop.f32.mrf.mxu1 }
 0x4fe   : > { %v1007_v42 = vmax.f32 %v985_v16, 0.0  ;;  %v977_v43 = vadd.f32 %v976_v60, %v2608_v25  ;;  %v852_v60 = vld [vmem:[#allocation2 + $0x8] sm:$0xff] }
 0x4ff   : > { %1920 = vmatpush3.bf16.msra.mxu0 %v849_v56  ;;  %v1937_v63 = vpop.f32.mrf.mxu1 }
 0x500   : > { %1921 = vmatprep.subr.bf16.mxu0 %v848_v61  ;;  %v998_v9 = vadd.f32 %v1937_v63, %v2616_v29  ;;  %v1013_v8 = vpack.c.bf16 %v1007_v42, %v1006_v45  ;;  %v1005_v46 = vmax.f32 %v977_v43, 0.0 }
 0x501   : > { %v989_v1 = vpop.f32.mrf.mxu1 }
 0x502   : > { %v990_v11 = vadd.f32 %v989_v1, %v2612_v27  ;;  %v1010_v18 = vmax.f32 %v998_v9, 0.0  ;;  %v1012_v49 = vpack.c.bf16 %v1005_v46, %v1004_v48 }
 0x503   : > { %1922 = vmatpush3.bf16.msra.mxu0 %v848_v61  ;;  %v1938_v10 = vpop.f32.mrf.mxu1 }
 0x504   : > { %v1001_v12 = vadd.f32 %v1938_v10, %v2614_v28  ;;  %1923 = vmatprep.subr.bf16.mxu0 %v847_v2  ;;  %v1008_v5 = vmax.f32 %v990_v11, 0.0 }
 0x505   : > { %v992_v15 = vpop.f32.mrf.mxu1 }
 0x506   : > { %v1011_v19 = vmax.f32 %v1001_v12, 0.0  ;;  %v993_v21 = vadd.f32 %v992_v15, %v2610_v26 }
 0x507   : > { %1924 = vmatpush3.bf16.msra.mxu0 %v847_v2 }
 0x508   : > { %v1015_v6 = vpack.c.bf16 %v1011_v19, %v1010_v18  ;;  %v1009_v41 = vmax.f32 %v993_v21, 0.0 }
 0x50a   : > { %v1014_v44 = vpack.c.bf16 %v1009_v41, %v1008_v5  ;;  %1926 = vmatmul.mubr.msk.bf16.vlgmr.msra.gmra.mxu0 %vm519_vm3, %v2149_v3  ;;  %1939 = vmatprep.subr.bf16.mxu0 %v1015_v6 }
 0x50b   : > { %1940 = vmatpush3.bf16.msra.mxu0 %v1015_v6  ;;  %1947 = vmatprep.mubr.msk.bf16.mxu0 %vm519_vm3, %v2653_v47 }
 0x50c   : > { %1941 = vmatprep.subr.bf16.mxu0 %v1014_v44 }
 0x50f   : > { %1942 = vmatpush3.bf16.msra.mxu0 %v1014_v44 }
 0x510   : > { %1943 = vmatprep.subr.bf16.mxu0 %v1013_v8 }
 0x513   : > { %1944 = vmatpush3.bf16.msra.mxu0 %v1013_v8 }
 0x514   : > { %1945 = vmatprep.subr.bf16.mxu0 %v1012_v49 }
 0x517   : > { %1946 = vmatpush3.bf16.msra.mxu0 %v1012_v49  ;;  %v1737_v49 = vld [vmem:[%s2600_s29 + $0xc] sm:$0xf] }
 0x51a   : > { %1948 = vmatmul.mubr.msk.bf16.vlgmr.msra.gmra.mxu0 %vm519_vm3, %v2667_v38 }
 0x51b   : > { %1951 = vmatprep.mubr.msk.bf16.mxu0 %vm519_vm3, %v2671_v39 }
 0x522   : > { %1952 = vmatmul.mubr.msk.bf16.gmra.mxu0 %vm519_vm3, %v2679_v40 }
 0x523   : > { %1985 = vmatprep.mubr.msk.bf16.mxu0 %vm519_vm3, %v2653_v47 }
 0x5ca   : > { %v1927_v52 = vpop.f32.mrf.mxu0 }
 0x5cb   : > { %v927_v53 = vadd.f32 %v1927_v52, %v853_v51  ;;  %v1177_v51 = vpack.c.bf16 %v1737_v49, %v1737_v49  ;;  %v2151_v52 = vld [vmem:[%s2522_s14 + $0x28] sm:$0xff]  }
 0x5cc   : > { %v910_v55 = vpop.f32.mrf.mxu0 }
 0x5cd   : > { %931 = vst.msk [vmem:[#allocation2 + $0x10] sm:$0xff] %vm686_vm4, %v927_v53  ;;  %v925_v56 = vadd.f32 %v910_v55, %v851_v54  ;;  %v1179_v53 = vsel %vm418_vm1, %v1177_v51, 0 }
 0x5ce   : > { %v1928_v58 = vpop.f32.mrf.mxu0 }
 0x5cf   : > { %929 = vst.msk [vmem:[#allocation2] sm:$0xff] %vm686_vm4, %v925_v56  ;;  %v928_v59 = vadd.f32 %v1928_v58, %v854_v57 }
 0x5d0   : > { %v913_v61 = vpop.f32.mrf.mxu0 }
 0x5d1   : > { %932 = vst.msk [vmem:[#allocation2 + $0x18] sm:$0xff] %vm686_vm4, %v928_v59  ;;  %v926_v47 = vadd.f32 %v913_v61, %v852_v60 }
 0x5d3   : > { %930 = vst.msk [vmem:[#allocation2 + $0x8] sm:$0xff] %vm686_vm4, %v926_v47 }
 0x5d4   : > { %v1095_v54 = vld [vmem:[#allocation2 + $0x10] sm:$0xff] }
 0x5d6   : > { %v1093_v57 = vld [vmem:[#allocation2] sm:$0xff] }
 0x5d8   : > { %v1096_v60 = vld [vmem:[#allocation2 + $0x18] sm:$0xff] }
 0x5da   : > { %v1949_v62 = vpop.f32.mrf.mxu0 }
 0x5db   : > { %v1059_v4 = vadd.f32 %v1949_v62, %v2622_v32 }
 0x5dc   : > { %v1050_v63 = vpop.f32.mrf.mxu0 }
 0x5dd   : > { %v1083_v45 = vmax.f32 %v1059_v4, 0.0  ;;  %v1051_v7 = vadd.f32 %v1050_v63, %v2620_v31 }
 0x5de   : > { %v1950_v0 = vpop.f32.mrf.mxu0 }
 0x5df   : > { %v1062_v18 = vadd.f32 %v1950_v0, %v2624_v33  ;;  %v1081_v48 = vmax.f32 %v1051_v7, 0.0 }
 0x5e0   : > { %v1053_v1 = vpop.f32.mrf.mxu0 }
 0x5e1   : > { %v1084_v42 = vmax.f32 %v1062_v18, 0.0  ;;  %v1054_v43 = vadd.f32 %v1053_v1, %v2618_v30 }
 0x5e2   : > { %v1953_v2 = vpop.f32.mrf.mxu0 }
 0x5e3   : > { %v1075_v10 = vadd.f32 %v1953_v2, %v2630_v36  ;;  %v1090_v8 = vpack.c.bf16 %v1084_v42, %v1083_v45  ;;  %v1082_v46 = vmax.f32 %v1054_v43, 0.0 }
 0x5e4   : > { %v1066_v9 = vpop.f32.mrf.mxu0 }
 0x5e5   : > { %v1067_v12 = vadd.f32 %v1066_v9, %v2626_v34  ;;  %v1087_v19 = vmax.f32 %v1075_v10, 0.0  ;;  %v1089_v50 = vpack.c.bf16 %v1082_v46, %v1081_v48 }
 0x5e6   : > { %v1954_v11 = vpop.f32.mrf.mxu0 }
 0x5e7   : > { %v1078_v15 = vadd.f32 %v1954_v11, %v2632_v37  ;;  %v1085_v5 = vmax.f32 %v1067_v12, 0.0 }
 0x5e8   : > { %v1069_v16 = vpop.f32.mrf.mxu0 }
 0x5e9   : > { %v1088_v21 = vmax.f32 %v1078_v15, 0.0  ;;  %v1070_v3 = vadd.f32 %v1069_v16, %v2628_v35 }
 0x5eb   : > { %v1092_v6 = vpack.c.bf16 %v1088_v21, %v1087_v19  ;;  %v1086_v41 = vmax.f32 %v1070_v3, 0.0 }
 0x5ed   : > { %v1091_v44 = vpack.c.bf16 %v1086_v41, %v1085_v5  ;;  %1955 = vmatprep.subr.bf16.mxu1 %v1092_v6 }
 0x5ee   : > { %1956 = vmatpush3.bf16.msra.mxu1 %v1092_v6 }
 0x5ef   : > { %1957 = vmatprep.subr.bf16.mxu1 %v1091_v44 }
 0x5f2   : > { %1958 = vmatpush3.bf16.msra.mxu1 %v1091_v44 }
 0x5f3   : > { %1959 = vmatprep.subr.bf16.mxu1 %v1090_v8 }
 0x5f6   : > { %1960 = vmatpush3.bf16.msra.mxu1 %v1090_v8 }
 0x5f7   : > { %1961 = vmatprep.subr.bf16.mxu1 %v1089_v50 }
 0x5fa   : > { %1962 = vmatpush3.bf16.msra.mxu1 %v1089_v50 }
 0x5fb   : > { %2016 = vmatprep.subr.msk.bf16.mxu1 %vm418_vm1, %v1177_v51 }
 0x5fd   : > { %1964 = vmatmul.mubr.msk.bf16.vlgmr.msra.gmra.mxu1 %vm519_vm3, %v2151_v52 }
 0x5fe   : > { %1968 = vmatpush3.bf16.msra.mxu1 %v1179_v53  ;;  %1969 = vmatprep.mubr.msk.bf16.mxu1 %vm405_vm2, %v2568_v14 }
 0x605   : > { %1970 = vmatmul.mubr.msk.bf16.vlgmr.msra.gmra.mxu1 %vm405_vm2, %v2565_v13  ;;  %v1094_v13 = vld [vmem:[#allocation2 + $0x8] sm:$0xff] }
 0x606   : > { %1973 = vmatprep.mubr.msk.bf16.mxu1 %vm405_vm2, %v2576_v17 }
 0x60d   : > { %1974 = vmatmul.mubr.msk.bf16.gmra.mxu1 %vm405_vm2, %v2584_v20 }
 0x6bd   : > { %v1965_v55 = vpop.f32.mrf.mxu1 }
 0x6be   : > { %v1169_v56 = vadd.f32 %v1965_v55, %v1095_v54 }
 0x6bf   : > { %v1152_v58 = vpop.f32.mrf.mxu1 }
 0x6c0   : > { %1173 = vst.msk [vmem:[#allocation2 + $0x10] sm:$0xff] %vm686_vm4, %v1169_v56  ;;  %v1167_v59 = vadd.f32 %v1152_v58, %v1093_v57 }
 0x6c1   : > { %v1966_v61 = vpop.f32.mrf.mxu1 }
 0x6c2   : > { %1171 = vst.msk [vmem:[#allocation2] sm:$0xff] %vm686_vm4, %v1167_v59  ;;  %v1170_v14 = vadd.f32 %v1966_v61, %v1096_v60  ;;  %v2153_v61 = vld [vmem:[%s2522_s14 + $0x38] sm:$0xff]  }
 0x6c3   : > { %v1155_v47 = vpop.f32.mrf.mxu1 }
 0x6c4   : > { %1174 = vst.msk [vmem:[#allocation2 + $0x18] sm:$0xff] %vm686_vm4, %v1170_v14  ;;  %v1168_v17 = vadd.f32 %v1155_v47, %v1094_v13 }
 0x6c5   : > { %v1971_v62 = vpop.f32.mrf.mxu1 }
 0x6c6   : > { %1172 = vst.msk [vmem:[#allocation2 + $0x8] sm:$0xff] %vm686_vm4, %v1168_v17  ;;  %v1224_v3 = vadd.f32 %v1971_v62, %v2602_v22 }
 0x6c7   : > { %v1215_v20 = vpop.f32.mrf.mxu1 }
 0x6c9   : > { %v1972_v63 = vpop.f32.mrf.mxu1  ;;  %v1335_v47 = vld [vmem:[#allocation2] sm:$0xff] }
 0x6ca   : > { %v1227_v16 = vadd.f32 %v1972_v63, %v2606_v24 }
 0x6cb   : > { %v1218_v0 = vpop.f32.mrf.mxu1  ;;  %v1338_v62 = vld [vmem:[#allocation2 + $0x18] sm:$0xff] }
 0x6cc   : > { %v1249_v41 = vmax.f32 %v1227_v16, 0.0 }
 0x6cd   : > { %v1975_v1 = vpop.f32.mrf.mxu1 }
 0x6ce   : > { %v1240_v9 = vadd.f32 %v1975_v1, %v2616_v29  ;;  %v1219_v29 = vadd.f32 %v1218_v0, %v2608_v25  ;;  %v1336_v0 = vld [vmem:[#allocation2 + $0x8] sm:$0xff] }
 0x6cf   : > { %v1231_v2 = vpop.f32.mrf.mxu1 }
 0x6d0   : > { %v1232_v11 = vadd.f32 %v1231_v2, %v2612_v27  ;;  %v1252_v18 = vmax.f32 %v1240_v9, 0.0  ;;  %v1248_v27 = vmax.f32 %v1224_v3, 0.0  ;;  %v1247_v43 = vmax.f32 %v1219_v29, 0.0 }
 0x6d1   : > { %v1976_v10 = vpop.f32.mrf.mxu1 }
 0x6d2   : > { %v1243_v12 = vadd.f32 %v1976_v10, %v2614_v28  ;;  %v1250_v4 = vmax.f32 %v1232_v11, 0.0  ;;  %v1216_v28 = vadd.f32 %v1215_v20, %v2604_v23  ;;  %v1255_v24 = vpack.c.bf16 %v1249_v41, %v1248_v27  ;;  %v2152_v23 = vld [vmem:[%s2522_s14 + $0x30] sm:$0xff]  }
 0x6d3   : > { %v1234_v15 = vpop.f32.mrf.mxu1  ;;  %2001 = vmatprep.mubr.msk.bf16.mxu1 %vm519_vm3, %v2152_v23 }
 0x6d4   : > { %v1253_v19 = vmax.f32 %v1243_v12, 0.0  ;;  %v1235_v21 = vadd.f32 %v1234_v15, %v2610_v26  ;;  %v1246_v26 = vmax.f32 %v1216_v28, 0.0 }
 0x6d6   : > { %v1257_v5 = vpack.c.bf16 %v1253_v19, %v1252_v18  ;;  %v1251_v6 = vmax.f32 %v1235_v21, 0.0  ;;  %v1254_v22 = vpack.c.bf16 %v1247_v43, %v1246_v26 }
 0x6d8   : > { %v1256_v42 = vpack.c.bf16 %v1251_v6, %v1250_v4  ;;  %1977 = vmatprep.subr.bf16.mxu0 %v1257_v5 }
 0x6d9   : > { %1978 = vmatpush3.bf16.msra.mxu0 %v1257_v5 }
 0x6da   : > { %1979 = vmatprep.subr.bf16.mxu0 %v1256_v42 }
 0x6dd   : > { %1980 = vmatpush3.bf16.msra.mxu0 %v1256_v42 }
 0x6de   : > { %1981 = vmatprep.subr.bf16.mxu0 %v1255_v24 }
 0x6e1   : > { %1982 = vmatpush3.bf16.msra.mxu0 %v1255_v24 }
 0x6e2   : > { %1983 = vmatprep.subr.bf16.mxu0 %v1254_v22 }
 0x6e5   : > { %1984 = vmatpush3.bf16.msra.mxu0 %v1254_v22 }
 0x6e8   : > { %1986 = vmatmul.mubr.msk.bf16.vlgmr.msra.gmra.mxu0 %vm519_vm3, %v2667_v38 }
 0x6e9   : > { %1989 = vmatprep.mubr.msk.bf16.mxu0 %vm519_vm3, %v2671_v39 }
 0x6f0   : > { %1990 = vmatmul.mubr.msk.bf16.gmra.mxu0 %vm519_vm3, %v2679_v40 }
 0x7a8   : > { %v1987_v25 = vpop.f32.mrf.mxu0 }
 0x7a9   : > { %v1301_v54 = vadd.f32 %v1987_v25, %v2622_v32 }
 0x7aa   : > { %v1292_v44 = vpop.f32.mrf.mxu0 }
 0x7ac   : > { %v1988_v45 = vpop.f32.mrf.mxu0 }
 0x7ad   : > { %v1304_v51 = vadd.f32 %v1988_v45, %v2624_v33 }
 0x7ae   : > { %v1295_v7 = vpop.f32.mrf.mxu0 }
 0x7af   : > { %v1326_v58 = vmax.f32 %v1304_v51, 0.0 }
 0x7b0   : > { %v1991_v8 = vpop.f32.mrf.mxu0 }
 0x7b1   : > { %v1317_v48 = vadd.f32 %v1991_v8, %v2630_v36  ;;  %v1296_v36 = vadd.f32 %v1295_v7, %v2618_v30  ;;  %v1337_v30 = vld [vmem:[#allocation2 + $0x10] sm:$0xff] }
 0x7b2   : > { %v1308_v46 = vpop.f32.mrf.mxu0 }
 0x7b3   : > { %v1309_v38 = vadd.f32 %v1308_v46, %v2626_v34  ;;  %v1329_v40 = vmax.f32 %v1317_v48, 0.0  ;;  %v1325_v34 = vmax.f32 %v1301_v54, 0.0  ;;  %v1324_v60 = vmax.f32 %v1296_v36, 0.0 }
 0x7b4   : > { %v1992_v49 = vpop.f32.mrf.mxu0 }
 0x7b5   : > { %v1320_v50 = vadd.f32 %v1992_v49, %v2632_v37  ;;  %v1327_v55 = vmax.f32 %v1309_v38, 0.0  ;;  %v1293_v37 = vadd.f32 %v1292_v44, %v2620_v31  ;;  %v1332_v33 = vpack.c.bf16 %v1326_v58, %v1325_v34 }
 0x7b6   : > { %v1311_v39 = vpop.f32.mrf.mxu0 }
 0x7b7   : > { %v1330_v52 = vmax.f32 %v1320_v50, 0.0  ;;  %v1312_v53 = vadd.f32 %v1311_v39, %v2628_v35  ;;  %v1323_v35 = vmax.f32 %v1293_v37, 0.0 }
 0x7b9   : > { %v1334_v56 = vpack.c.bf16 %v1330_v52, %v1329_v40  ;;  %v1328_v57 = vmax.f32 %v1312_v53, 0.0  ;;  %v1331_v32 = vpack.c.bf16 %v1324_v60, %v1323_v35 }
 0x7bb   : > { %v1333_v59 = vpack.c.bf16 %v1328_v57, %v1327_v55  ;;  %1993 = vmatprep.subr.bf16.mxu1 %v1334_v56 }
 0x7bc   : > { %1994 = vmatpush3.bf16.msra.mxu1 %v1334_v56 }
 0x7bd   : > { %1995 = vmatprep.subr.bf16.mxu1 %v1333_v59 }
 0x7c0   : > { %1996 = vmatpush3.bf16.msra.mxu1 %v1333_v59 }
 0x7c1   : > { %1997 = vmatprep.subr.bf16.mxu1 %v1332_v33 }
 0x7c4   : > { %1998 = vmatpush3.bf16.msra.mxu1 %v1332_v33 }
 0x7c5   : > { %1999 = vmatprep.subr.bf16.mxu1 %v1331_v32 }
 0x7c8   : > { %2000 = vmatpush3.bf16.msra.mxu1 %v1331_v32 }
 0x7cb   : > { %2002 = vmatmul.mubr.msk.bf16.vlgmr.msra.gmra.mxu1 %vm519_vm3, %v2153_v61 }
 0x88b   : > { %v2003_v14 = vpop.f32.mrf.mxu1 }
 0x88c   : > { %v1411_v13 = vadd.f32 %v2003_v14, %v1337_v30 }
 0x88d   : > { %v1394_v17 = vpop.f32.mrf.mxu1 }
 0x88e   : > { %1415 = vst.msk [vmem:[#allocation2 + $0x10] sm:$0xff] %vm686_vm4, %v1411_v13  ;;  %v1409_v31 = vadd.f32 %v1394_v17, %v1335_v47 }
 0x88f   : > { %v2004_v20 = vpop.f32.mrf.mxu1 }
 0x890   : > { %1413 = vst.msk [vmem:[#allocation2] sm:$0xff] %vm686_vm4, %v1409_v31  ;;  %v1412_v63 = vadd.f32 %v2004_v20, %v1338_v62  ;;  %1420 = sbr.rel (%p1754_p13) target bundleno = 2530 (0x9e2), region = 52 }
 0x891   : > { %v1397_v1 = vpop.f32.mrf.mxu1 }
 0x892   : > { %1416 = vst.msk [vmem:[#allocation2 + $0x18] sm:$0xff] %vm686_vm4, %v1412_v63  ;;  %v1410_v2 = vadd.f32 %v1397_v1, %v1336_v0 }
 0x894   : > { %1414 = vst.msk [vmem:[#allocation2 + $0x8] sm:$0xff] %vm686_vm4, %v1410_v2 }
 0x895   : > { %vm1441_vm5 = vcmask 125952   ;;  %v1423_v11 = vld [vmem:[#allocation2 + $0x10] sm:$0xff]  ;;  %v2344_v19 = vmov 0.0   ;;  %vm2345_vm6 = vmmov 0   ;;  %vm1495_vm7 = vcmask 261120  }
 0x896   : > { %v1771_v16 = vpack.c.bf16 %v1423_v11, %v1423_v11  ;;  %2005 = vmatprep.subr.bf16.mxu0 %v2344_v19  ;;  %2009 = vmatprep.mubr.msk.bf16.mxu0 %vm2345_vm6, %v2344_v19 }
 0x897   : > { %v1421_v9 = vld [vmem:[#allocation2] sm:$0xff] }
 0x898   : > { %1446 = vxpose.xlu0.b32.start [1/4] (short) (narrow) %v1421_v9, 16  ;;  %v1769_v12 = vpack.c.bf16 %v1421_v9, %v1421_v9  ;;  %1444 = vst.msk [vmem:[#allocation3 + $0x8] sm:$0xf] %vm1441_vm5, %v1771_v16 }
 0x899   : > { %v1424_v18 = vld [vmem:[#allocation2 + $0x18] sm:$0xff] }
 0x89a   : > { %v1772_v21 = vpack.c.bf16 %v1424_v18, %v1424_v18  ;;  %1442 = vst.msk [vmem:[#allocation3] sm:$0xf] %vm1441_vm5, %v1769_v12 }
 0x89b   : > { %v1422_v10 = vld [vmem:[#allocation2 + $0x8] sm:$0xff] }
 0x89c   : > { %v1770_v15 = vpack.c.bf16 %v1422_v10, %v1422_v10  ;;  %1445 = vst.msk [vmem:[#allocation3 + $0xc] sm:$0xf] %vm1441_vm5, %v1772_v21  ;;  %1447 = vxpose.xlu0.b32.cont [2/4] (short) (narrow) %v1422_v10, 16 }
 0x89e   : > { %1443 = vst.msk [vmem:[#allocation3 + $0x4] sm:$0xf] %vm1441_vm5, %v1770_v15 }
 0x8a0   : > { %1448 = vxpose.xlu0.b32.cont [3/4] (short) (narrow) %v1423_v11, 16 }
 0x8a3   : > { %v2154_v3 = vld [vmem:[#allocation3 + $0x8] sm:$0xff]  }
 0x8a4   : > { %1449 = vxpose.xlu0.b32.end [4/4] (short) (narrow) %v1424_v18, 16  ;;  %2006 = vmatpush3.bf16.msra.mxu0 %v2154_v3 }
 0x8a5   : > { %v2155_v4 = vld [vmem:[#allocation3] sm:$0xff]   ;;  %2007 = vmatprep.subr.bf16.mxu0 %v2344_v19 }
 0x8a8   : > { %2008 = vmatpush3.bf16.msra.mxu0 %v2155_v4 }
 0x914   : > { %v1462_v5 = vpop.trf.xlu0 }
 0x918   : > { %v1463_v6 = vpop.trf.xlu0 }
 0x919   : > { %v1478_v41 = vpack.c.bf16 %v1463_v6, %v1462_v5 }
 0x91b   : > { %2010 = vmatmul.mubr.msk.bf16.vlgmr.msra.gmra.mxu0 %vm1495_vm7, %v1478_v41 }
 0x9db   : > { %v1533_v29 = vpop.f32.mrf.mxu0 }
 0x9dc   : > { %1540 = vst [vmem:[%s2634_s12] sm:$0xff] %v1533_v29 }
 0x9dd   : > { %v2011_v42 = vpop.f32.mrf.mxu0 }
 0x9df   : > { %v1536_v27 = vpop.f32.mrf.mxu0 }
 0x9e0   : > { %1541 = vst [vmem:[%s2634_s12 + $0x8] sm:$0xff] %v1536_v27 }
 0x9e1   : > { %v2012_v28 = vpop.f32.mrf.mxu0 }
 0x9e2 PF: > { %s1773_s21 = sshll.u32 %s2322_s22, 8  ;;  %s2938_s11 = sld [smem:[#allocation19_spill]] }
 0x9e3   : > { %s1556_s26 = sshll.u32 %s2634_s12, 4  ;;  %s2846_s9 = scalar_lea.sflag [#allocation6], %s267_s30  ;;  %s2842_s26 = int_to_ptr.vmem [resolvable:$true] %s1556_s26 }
 0x9e4   : > { %s2210_s4 = scalar_lea.vmem %s2842_s26, 256  ;;  %p2939_p5 = scmp.ne.s32.totalorder %s2927_s5, 0 }
 0x9e5   : > { %p2211_p4 = scmp.ne.s32.totalorder %s2842_s26, %s2210_s4  ;;  %s2346_s22 = smov [#allocation9]  }
 0x9e6   : > { %s2214_s25 = sshll.u32 %s2346_s22, 4  ;;  %s2215_s25 = int_to_ptr.vmem [resolvable:$false] %s2214_s25 }
 0x9e7   : > { %p2212_p6 = pnand %p2211_p4, %p2939_p5  ;;  %s2216_s28 = scalar_lea.vmem %s2215_s25, 512 }
 0x9e8   : > { %s2839_s18 = scalar_lea.hbm %s2938_s11, %s1773_s21  ;;  %p2217_p7 = scmp.lt.s32.totalorder %s2842_s26, %s2215_s25 }
 0x9e9   : > { %p2213_p8 = pneg %p2212_p6  ;;  %p2218_p9 = scmp.lt.s32.totalorder %s2216_s28, %s2210_s4 }
 0x9eb   : > { %p2219_p10 = por %p2218_p9, %p2217_p7 }
 0x9ed   : > { %p2220_p12 = pnand %p2219_p10, %p2213_p8 }
 0x9ef   : > { %2223 = shalt.err (!%p2220_p12)
}
 0x9f0   : > { %s2224_s30 = scalar_lea.hbm %s2839_s18, 256  ;;  %s2228_s8 = scalar_lea.hbm %s2938_s11, 512 }
 0x9f1   : > { %p2225_p0 = scmp.ne.s32.totalorder %s2839_s18, %s2224_s30  ;;  %p2229_p3 = scmp.lt.s32.totalorder %s2839_s18, %s2938_s11 }
 0x9f2   : > { %p2230_p11 = scmp.lt.s32.totalorder %s2228_s8, %s2224_s30 }
 0x9f3   : > { %p2226_p2 = pnand %p2225_p0, %p2939_p5 }
 0x9f4   : > { %p2231_p13 = por %p2230_p11, %p2229_p3 }
 0x9f5   : > { %p2227_p1 = pneg %p2226_p2 }
 0x9f7   : > { %p2232_p4 = pnand %p2231_p13, %p2227_p1 }
 0x9f9   : > { %2235 = shalt.err (!%p2232_p4)
}
 0x9fa   : > { %s2347_s29 = smov 128   ;;  %s2348_s12 = smov 8  }
 0x9fb   : > { %2023 = dma.vmem_to_hbm [thread:$0]  (%p2939_p5), %s2842_s26, 256, %s2839_s18, %s2846_s9, %s2347_s29, %s2347_s29, %s2348_s12  }
 0x9fc PF: > { %s2940_s21 = sld [smem:[#allocation14_spill]] }
 0x9fd   : > { %s2941_s14 = sld [smem:[#allocation13_spill]] }
 0x9fe   : > { %s2942_s15 = sld [smem:[#allocation15_spill]] }
 0xa02   : > { %p2040_p6 = scmp.ge.s32.totalorder %s2940_s21, 2 }
 0xa03   : > { %s1571_s4 = sand.u32 1, %s2941_s14  }
 0xa04   : > { %p2943_p8 = scmp.ne.s32.totalorder %s2942_s15, 0  ;;  %s1572_s22 = scalar_lea.sflag [#allocation6], %s1571_s4 }
 0xa06   : > { %p2034_p7 = pnand %p2040_p6, %p2943_p8 }
 0xa08   : > { %p2035_p9 = pneg %p2034_p7 }
 0xa0a   : > { %2289 = dma.done.wait (%p2035_p9), %s1572_s22, 256  }
 0xa0b   : > { %2291 = vsyncadd (%p2035_p9), %s1572_s22, 4294967040  ;;  %s21_s25 = sadd.s32 1, %s2940_s21   ;;  %s2944_s5 = sld [smem:[#allocation16_spill]] }
 0xa0c   : > { %p18_p10 = scmp.ge.s32.totalorder %s21_s25, 6   ;;  %s2945_s26 = sld [smem:[#allocation17_spill]] }
 0xa0d   : > { %s2946_s15 = smov %s2298_s16  ;;  %s2947_s16 = smov %s2302_s17 }
 0xa0e   : > { %s2948_s17 = smov %s2497_s2  ;;  %s2949_s18 = smov %s2310_s19 }
 0xa0f   : > { %s2950_s19 = smov %s2314_s20  ;;  %s2951_s20 = smov %s2488_s10 }
 0xa10   : > { %s2952_s21 = smov %s2326_s23  ;;  %s2953_s22 = smov %s2330_s24 }
 0xa11   : > { %s2954_s23 = smov %s2944_s5  ;;  %20 = sbr.rel (!%p18_p10) target bundleno = 13 (0xd), region = 103 }
 0xa12   : > { %s2955_s24 = smov %s2945_s26 }
 0xa16   :  { %1577 = vsyncpa [#allocation5], 1 }
 0xa17   :  { %1579 = vsyncpa [#allocation5 + $0x1], 1 }
 0xa18   :  { %1580 = vsyncpa [#allocation8], 1 }
 0xa19   :  { %1582 = vsyncpa [#allocation8 + $0x1], 1 }
 0xa1a   :  { %1583 = vsyncpa [#allocation6], 1 }
 0xa1b   :  { %1585 = vsyncpa [#allocation6 + $0x1], 1 }

</bundles_post_ra>
